<compile_context>
chip_gen: v7x
topology: tpu7x:2x2x1
jax: 0.10.0
libtpu: 0.0.40
codegen_flags: <defaults>
</compile_context>

<pallas_src>
import functools

import jax
import jax.numpy as jnp
from jax.experimental import pallas as pl
from jax.experimental.pallas import tpu as pltpu


def _round_up(n, m):
    return ((n + m - 1) // m) * m


def _const_index(i):
    return (0, 0)


def _svd_mlp_kernel(x_ref, wv_ref, gate_uT_ref, up_uT_ref, down_vT_ref,
                    down_uT_ref, o_ref, *, compute_dtype, ew_dtype):
    rp = gate_uT_ref.shape[0]            # padded lora rank (static, 128-multiple)

    # x arrives in its native dtype; cast on-chip (VPU) instead of a wrapper pass.
    x = x_ref[...].astype(compute_dtype)                          # [TM, Hp]

    # Fused first stage: x @ [gate_v^T | up_v^T] -> [TM, 2*rp].
    # MXU accumulates f32 internally; emit compute_dtype directly (no cast pass).
    low = jnp.dot(x, wv_ref[...], preferred_element_type=compute_dtype)
    gate_low = low[:, :rp]               # static, 128-aligned lane slices
    up_low = low[:, rp:]

    # Second stage: rank -> intermediate; emit in elementwise dtype.
    gate = jnp.dot(gate_low, gate_uT_ref[...], preferred_element_type=ew_dtype)
    up = jnp.dot(up_low, up_uT_ref[...], preferred_element_type=ew_dtype)

    # act_fn = silu (OLMoE hidden_act).
    h = (gate * jax.nn.sigmoid(gate)) * up

    # Third / fourth stage: intermediate -> rank -> hidden.
    down_low = jnp.dot(h.astype(compute_dtype), down_vT_ref[...],
                       preferred_element_type=compute_dtype)
    out = jnp.dot(down_low, down_uT_ref[...], preferred_element_type=jnp.float32)

    o_ref[...] = out.astype(o_ref.dtype)


def prepack_svd_mlp_params(params, compute_dtype=jnp.bfloat16):
    """One-time weight prep: transpose to [in,out], pad lane dims to 128,
    fuse gate_v/up_v, and cast to the MXU compute dtype."""
    I, r = params["gate_u"].shape        # nn.Linear layout: [out, in]
    _, H = params["gate_v"].shape

    Hp = _round_up(H, 128)
    Ip = _round_up(I, 128)
    rp = _round_up(r, 128)

    def pack(w, rows, cols):             # w: [out,in] -> padded [in,out]
        wT = jnp.asarray(w).T
        wT = jnp.pad(wT, ((0, rows - wT.shape[0]), (0, cols - wT.shape[1])))
        return wT.astype(compute_dtype)

    gate_vT = pack(params["gate_v"], Hp, rp)                 # [Hp, rp]
    up_vT = pack(params["up_v"], Hp, rp)                     # [Hp, rp]
    return {
        "wv": jnp.concatenate([gate_vT, up_vT], axis=1),     # [Hp, 2*rp]
        "gate_uT": pack(params["gate_u"], rp, Ip),           # [rp, Ip]
        "up_uT": pack(params["up_u"], rp, Ip),                # [rp, Ip]
        "down_vT": pack(params["down_v"], Ip, rp),             # [Ip, rp]
        "down_uT": pack(params["down_u"], rp, Hp),              # [rp, Hp]
        "H": H, "I": I, "r": r, "Hp": Hp, "Ip": Ip, "rp": rp,
        "compute_dtype": compute_dtype,
    }


def _vmem_budget_bytes():
    """Per-TensorCore VMEM budget with headroom for Mosaic internals."""
    try:
        cap = int(pltpu.get_tpu_info().vmem_capacity_bytes)
    except Exception:
        cap = 64 << 20                   # v7x per-TC capacity (most conservative)
    return max(cap - (8 << 20), 32 << 20)


def _vmem_estimate(tm, Hp, Ip, rp, x_item, out_item, w_bytes, c_item, e_item):
    """Explicit per-step VMEM accounting (tiles, resident weights, temporaries)."""
    b = 2 * tm * Hp * x_item             # x tile, double-buffered
    b += 2 * tm * Hp * out_item          # out tile, double-buffered
    b += w_bytes                         # resident weights (single-buffered)
    b += tm * 2 * rp * c_item            # fused low = [gate_low | up_low]
    b += 3 * tm * Ip * e_item            # gate, up, h
    b += tm * rp * c_item                # down_low
    b += tm * Hp * 4                     # f32 accumulator of the final dot
    return b


def svd_olmoe_mlp(x, packed, *, tm_max=1024, out_dtype=None, ew_dtype=None):
    """x: [B, S, H]. packed: output of prepack_svd_mlp_params."""
    B, S, H = x.shape
    assert H == packed["H"]
    Hp, Ip, rp = packed["Hp"], packed["Ip"], packed["rp"]
    compute_dtype = packed["compute_dtype"]
    out_dtype = compute_dtype if out_dtype is None else out_dtype
    ew_dtype = compute_dtype if ew_dtype is None else ew_dtype

    weights = (packed["wv"], packed["gate_uT"], packed["up_uT"],
               packed["down_vT"], packed["down_uT"])
    w_bytes = sum(int(w.nbytes) for w in weights)

    x_item = jnp.dtype(x.dtype).itemsize
    out_item = jnp.dtype(out_dtype).itemsize
    c_item = jnp.dtype(compute_dtype).itemsize
    e_item = jnp.dtype(ew_dtype).itemsize

    # Sublane packing: 8 rows per 32-bit vreg; sub-32-bit dtypes pack deeper,
    # so the token tile must be a multiple of 16 for bf16 (32 for 8-bit).
    min_item = min(x_item, out_item, c_item)
    sub = 8 * (4 // min_item)

    T = B * S
    # Prefer a TM that divides T so no token-row padding / output slicing is needed.
    if T <= tm_max:
        TM = _round_up(T, sub)
    else:
        TM = 0
        for cand in range((min(tm_max, T) // sub) * sub, 0, -sub):
            if T % cand == 0:
                TM = cand
                break
        if TM == 0:
            TM = max(sub, (tm_max // sub) * sub)

    # Shrink TM until the per-step footprint fits the chip's VMEM budget.
    budget = _vmem_budget_bytes()

    def est(tm):
        return _vmem_estimate(tm, Hp, Ip, rp, x_item, out_item, w_bytes,
                              c_item, e_item)

    while TM > sub and est(TM) > budget:
        TM = max(sub, ((TM // 2) // sub) * sub)

    T_pad = _round_up(T, TM)
    grid = (T_pad // TM,)

    x2d = x.reshape(T, H)
    needs_pad = (T_pad != T) or (Hp != H)
    if needs_pad:
        # Only for non-tile-aligned shapes (real OLMoE shapes take the
        # zero-copy path: H=2048 is a 128-multiple and TM divides T).
        x2d = jnp.pad(x2d, ((0, T_pad - T), (0, Hp - H)))

    x_spec = pl.BlockSpec((TM, Hp), lambda i: (i, 0))
    o_spec = pl.BlockSpec((TM, Hp), lambda i: (i, 0))

    flops = 2 * T_pad * (Hp * 2 * rp + 2 * rp * Ip + Ip * rp + rp * Hp)
    bytes_accessed = int(x2d.nbytes) + w_bytes + T_pad * Hp * out_item
    cost = pl.CostEstimate(flops=flops, transcendentals=T_pad * Ip,
                           bytes_accessed=bytes_accessed)

    vmem_limit = int(min(max(est(TM) + (8 << 20), 32 << 20), budget))

    kernel = functools.partial(_svd_mlp_kernel, compute_dtype=compute_dtype,
                               ew_dtype=ew_dtype)

    def build(single_buffer_weights):
        if single_buffer_weights:
            # Constant index_map -> nothing to overlap after the first fetch;
            # single-buffering frees a full weight-set of VMEM.
            w_specs = [pl.BlockSpec(w.shape, _const_index,
                                    pipeline_mode=pl.Buffered(1))
                       for w in weights]
        else:
            w_specs = [pl.BlockSpec(w.shape, _const_index) for w in weights]
        return pl.pallas_call(
            kernel,
            out_shape=jax.ShapeDtypeStruct((T_pad, Hp), out_dtype),
            grid=grid,
            in_specs=[x_spec] + w_specs,
            out_specs=o_spec,
            compiler_params=pltpu.CompilerParams(
                dimension_semantics=("parallel",),
                vmem_limit_bytes=vmem_limit,
            ),
            cost_estimate=cost,
        )

    try:
        out2d = build(True)(x2d, *weights)
    except Exception:
        # Fallback for JAX versions without BlockSpec(pipeline_mode=pl.Buffered).
        out2d = build(False)(x2d, *weights)

    if needs_pad:
        out2d = out2d[:T, :H]
    return out2d.reshape(B, S, H)


def svd_olmoe_mlp_ref(x, params):
    """Pure-JAX reference matching the PyTorch forward exactly."""
    def lin(v, w):  # nn.Linear: v @ w.T
        return jnp.einsum("...i,oi->...o", v, w)
    up = lin(lin(x, params["up_v"]), params["up_u"])
    gate = lin(lin(x, params["gate_v"]), params["gate_u"])
    h = jax.nn.silu(gate) * up
    return lin(lin(h, params["down_v"]), params["down_u"])


def _make_params(key, hidden_size, intermediate_size, lora_rank, scale=0.05):
    keys = jax.random.split(key, 6)
    # PyTorch nn.Linear weight layout: [out_features, in_features]
    return {
        "gate_u": scale * jax.random.normal(keys[0], (intermediate_size, lora_rank), jnp.float32),
        "gate_v": scale * jax.random.normal(keys[1], (lora_rank, hidden_size), jnp.float32),
        "down_u": scale * jax.random.normal(keys[2], (hidden_size, lora_rank), jnp.float32),
        "down_v": scale * jax.random.normal(keys[3], (lora_rank, intermediate_size), jnp.float32),
        "up_u": scale * jax.random.normal(keys[4], (intermediate_size, lora_rank), jnp.float32),
        "up_v": scale * jax.random.normal(keys[5], (lora_rank, hidden_size), jnp.float32),
    }


if __name__ == "__main__":
    key = jax.random.PRNGKey(0)
    k_params, k_x, k_params2, k_x2 = jax.random.split(key, 4)

    # --- Config 1: tiny, non-128-aligned (exercises the padding path) ------
    batch, seq, hidden_size, intermediate_size, lora_rank = 2, 8, 32, 64, 16
    params = _make_params(k_params, hidden_size, intermediate_size, lora_rank)
    x = jax.random.normal(k_x, (batch, seq, hidden_size), jnp.float32)
    ref = svd_olmoe_mlp_ref(x, params)

    # 1) Exactness: f32 compute path must match the reference tightly.
    packed_f32 = prepack_svd_mlp_params(params, compute_dtype=jnp.float32)
    out_f32 = jax.block_until_ready(svd_olmoe_mlp(x, packed_f32))
    assert out_f32.shape == (batch, seq, hidden_size)
    assert jnp.allclose(out_f32, ref, atol=1e-5, rtol=1e-5), "f32 path mismatch vs reference"

    # 2) Fast path: bf16 MXU operands + bf16 elementwise + bf16 output.
    packed_bf16 = prepack_svd_mlp_params(params, compute_dtype=jnp.bfloat16)
    out_bf16 = jax.block_until_ready(svd_olmoe_mlp(x, packed_bf16))
    assert out_bf16.shape == (batch, seq, hidden_size)
    out_bf16_f32 = jnp.asarray(out_bf16, jnp.float32)
    assert bool(jnp.isfinite(out_bf16_f32).all()), "bf16 path produced non-finite values"
    rel_err = float(jnp.max(jnp.abs(out_bf16_f32 - ref)) / (jnp.max(jnp.abs(ref)) + 1e-12))
    assert rel_err < 0.1, f"bf16 path rel err too large: {rel_err}"

    # --- Config 2: 128-aligned H and divisible T (exercises the zero-pad path)
    b2, s2, h2, i2, r2 = 1, 64, 128, 256, 64
    params2 = _make_params(k_params2, h2, i2, r2)
    x2 = jax.random.normal(k_x2, (b2, s2, h2), jnp.float32)
    ref2 = svd_olmoe_mlp_ref(x2, params2)
    packed2 = prepack_svd_mlp_params(params2, compute_dtype=jnp.float32)
    out2 = jax.block_until_ready(svd_olmoe_mlp(x2, packed2))
    assert out2.shape == (b2, s2, h2)
    assert jnp.allclose(out2, ref2, atol=1e-5, rtol=1e-5), "aligned-shape f32 path mismatch"

    print("KERNEL_OK")
</pallas_src>

<mosaic_0001>
module attributes {stable_mosaic.version = 11 : i64} {
  func.func @_svd_mlp_kernel(%arg0: i32, %arg1: memref<16x128xf32, #tpu.memory_space<vmem>>, %arg2: memref<128x256xf32, #tpu.memory_space<vmem>>, %arg3: memref<128x128xf32, #tpu.memory_space<vmem>>, %arg4: memref<128x128xf32, #tpu.memory_space<vmem>>, %arg5: memref<128x128xf32, #tpu.memory_space<vmem>>, %arg6: memref<128x128xf32, #tpu.memory_space<vmem>>, %arg7: memref<16x128xf32, #tpu.memory_space<vmem>>) attributes {dimension_semantics = [#tpu.dimension_semantics<parallel>], iteration_bounds = array<i64: 1>, scalar_prefetch = 0 : i64, scratch_operands = 0 : i64, tpu.core_type = #tpu.core_type<tc>, window_params = [{transform_indices = @transform_0, window_bounds = array<i64: 16, 128>}, {pipeline_mode = #tpu.pipeline_mode<synchronous>, transform_indices = @transform_1, window_bounds = array<i64: 128, 256>}, {pipeline_mode = #tpu.pipeline_mode<synchronous>, transform_indices = @transform_2, window_bounds = array<i64: 128, 128>}, {pipeline_mode = #tpu.pipeline_mode<synchronous>, transform_indices = @transform_3, window_bounds = array<i64: 128, 128>}, {pipeline_mode = #tpu.pipeline_mode<synchronous>, transform_indices = @transform_4, window_bounds = array<i64: 128, 128>}, {pipeline_mode = #tpu.pipeline_mode<synchronous>, transform_indices = @transform_5, window_bounds = array<i64: 128, 128>}, {transform_indices = @transform_6, window_bounds = array<i64: 16, 128>}]} {
    %c0 = arith.constant 0 : index
    %c0_0 = arith.constant 0 : index
    %0 = vector.load %arg1[%c0, %c0_0] : memref<16x128xf32, #tpu.memory_space<vmem>>, vector<16x128xf32>
    %c0_1 = arith.constant 0 : index
    %c0_2 = arith.constant 0 : index
    %1 = vector.load %arg2[%c0_1, %c0_2] : memref<128x256xf32, #tpu.memory_space<vmem>>, vector<128x256xf32>
    %cst = arith.constant dense<0.000000e+00> : vector<16x256xf32>
    %2 = tpu.matmul %0, %1, %cst {dimension_numbers = #tpu.dot_dimension_numbers<[1], [0], [0], [1], [0, 0, 1, 1], [], []>} : vector<16x128xf32>, vector<128x256xf32>, vector<16x256xf32> -> vector<16x256xf32>
    %3 = vector.extract_strided_slice %2 {offsets = [0, 0], sizes = [16, 128], strides = [1, 1]} : vector<16x256xf32> to vector<16x128xf32>
    %4 = vector.extract_strided_slice %2 {offsets = [0, 128], sizes = [16, 128], strides = [1, 1]} : vector<16x256xf32> to vector<16x128xf32>
    %c0_3 = arith.constant 0 : index
    %c0_4 = arith.constant 0 : index
    %5 = vector.load %arg3[%c0_3, %c0_4] : memref<128x128xf32, #tpu.memory_space<vmem>>, vector<128x128xf32>
    %cst_5 = arith.constant dense<0.000000e+00> : vector<16x128xf32>
    %6 = tpu.matmul %3, %5, %cst_5 {dimension_numbers = #tpu.dot_dimension_numbers<[1], [0], [0], [1], [0, 0, 1, 1], [], []>} : vector<16x128xf32>, vector<128x128xf32>, vector<16x128xf32> -> vector<16x128xf32>
    %c0_6 = arith.constant 0 : index
    %c0_7 = arith.constant 0 : index
    %7 = vector.load %arg4[%c0_6, %c0_7] : memref<128x128xf32, #tpu.memory_space<vmem>>, vector<128x128xf32>
    %cst_8 = arith.constant dense<0.000000e+00> : vector<16x128xf32>
    %8 = tpu.matmul %4, %7, %cst_8 {dimension_numbers = #tpu.dot_dimension_numbers<[1], [0], [0], [1], [0, 0, 1, 1], [], []>} : vector<16x128xf32>, vector<128x128xf32>, vector<16x128xf32> -> vector<16x128xf32>
    %9 = arith.negf %6 : vector<16x128xf32>
    %10 = math.exp %9 : vector<16x128xf32>
    %cst_9 = arith.constant 1.000000e+00 : f32
    %11 = vector.broadcast %cst_9 : f32 to vector<16x128xf32>
    %12 = arith.addf %11, %10 : vector<16x128xf32>
    %13 = arith.divf %11, %12 : vector<16x128xf32>
    %14 = arith.mulf %6, %13 : vector<16x128xf32>
    %15 = arith.mulf %14, %8 : vector<16x128xf32>
    %c0_10 = arith.constant 0 : index
    %c0_11 = arith.constant 0 : index
    %16 = vector.load %arg5[%c0_10, %c0_11] : memref<128x128xf32, #tpu.memory_space<vmem>>, vector<128x128xf32>
    %cst_12 = arith.constant dense<0.000000e+00> : vector<16x128xf32>
    %17 = tpu.matmul %15, %16, %cst_12 {dimension_numbers = #tpu.dot_dimension_numbers<[1], [0], [0], [1], [0, 0, 1, 1], [], []>} : vector<16x128xf32>, vector<128x128xf32>, vector<16x128xf32> -> vector<16x128xf32>
    %c0_13 = arith.constant 0 : index
    %c0_14 = arith.constant 0 : index
    %18 = vector.load %arg6[%c0_13, %c0_14] : memref<128x128xf32, #tpu.memory_space<vmem>>, vector<128x128xf32>
    %cst_15 = arith.constant dense<0.000000e+00> : vector<16x128xf32>
    %19 = tpu.matmul %17, %18, %cst_15 {dimension_numbers = #tpu.dot_dimension_numbers<[1], [0], [0], [1], [0, 0, 1, 1], [], []>} : vector<16x128xf32>, vector<128x128xf32>, vector<16x128xf32> -> vector<16x128xf32>
    %c0_16 = arith.constant 0 : index
    %c0_17 = arith.constant 0 : index
    %20 = vector.load %arg7[%c0_16, %c0_17] : memref<16x128xf32, #tpu.memory_space<vmem>>, vector<16x128xf32>
    tpu.vector_store %arg7[%c0_16, %c0_17], %19 {strides = array<i32>} : memref<16x128xf32, #tpu.memory_space<vmem>>, vector<16x128xf32>,
    return
  }
  func.func @transform_0(%arg0: i32) -> (i32, i32) {
    %c0_i32 = arith.constant 0 : i32
    %c0_i32_0 = arith.constant 0 : i32
    return %arg0, %c0_i32 : i32, i32
  }
  func.func @transform_1(%arg0: i32) -> (i32, i32) {
    %c0_i32 = arith.constant 0 : i32
    %c0_i32_0 = arith.constant 0 : i32
    %c0_i32_1 = arith.constant 0 : i32
    return %c0_i32, %c0_i32_0 : i32, i32
  }
  func.func @transform_2(%arg0: i32) -> (i32, i32) {
    %c0_i32 = arith.constant 0 : i32
    %c0_i32_0 = arith.constant 0 : i32
    %c0_i32_1 = arith.constant 0 : i32
    return %c0_i32, %c0_i32_0 : i32, i32
  }
  func.func @transform_3(%arg0: i32) -> (i32, i32) {
    %c0_i32 = arith.constant 0 : i32
    %c0_i32_0 = arith.constant 0 : i32
    %c0_i32_1 = arith.constant 0 : i32
    return %c0_i32, %c0_i32_0 : i32, i32
  }
  func.func @transform_4(%arg0: i32) -> (i32, i32) {
    %c0_i32 = arith.constant 0 : i32
    %c0_i32_0 = arith.constant 0 : i32
    %c0_i32_1 = arith.constant 0 : i32
    return %c0_i32, %c0_i32_0 : i32, i32
  }
  func.func @transform_5(%arg0: i32) -> (i32, i32) {
    %c0_i32 = arith.constant 0 : i32
    %c0_i32_0 = arith.constant 0 : i32
    %c0_i32_1 = arith.constant 0 : i32
    return %c0_i32, %c0_i32_0 : i32, i32
  }
  func.func @transform_6(%arg0: i32) -> (i32, i32) {
    %c0_i32 = arith.constant 0 : i32
    %c0_i32_0 = arith.constant 0 : i32
    return %arg0, %c0_i32 : i32, i32
  }
}

module attributes {stable_mosaic.version = 11 : i64} {
  func.func @_svd_mlp_kernel(%arg0: i32, %arg1: memref<16x128xf32, #tpu.memory_space<vmem>>, %arg2: memref<128x256xf32, #tpu.memory_space<vmem>>, %arg3: memref<128x128xf32, #tpu.memory_space<vmem>>, %arg4: memref<128x128xf32, #tpu.memory_space<vmem>>, %arg5: memref<128x128xf32, #tpu.memory_space<vmem>>, %arg6: memref<128x128xf32, #tpu.memory_space<vmem>>, %arg7: memref<16x128xf32, #tpu.memory_space<vmem>>) attributes {dimension_semantics = [#tpu.dimension_semantics<parallel>], iteration_bounds = array<i64: 1>, scalar_prefetch = 0 : i64, scratch_operands = 0 : i64, tpu.core_type = #tpu.core_type<tc>, window_params = [{transform_indices = @transform_0, window_bounds = array<i64: 16, 128>}, {pipeline_mode = #tpu.pipeline_mode<synchronous>, transform_indices = @transform_1, window_bounds = array<i64: 128, 256>}, {pipeline_mode = #tpu.pipeline_mode<synchronous>, transform_indices = @transform_2, window_bounds = array<i64: 128, 128>}, {pipeline_mode = #tpu.pipeline_mode<synchronous>, transform_indices = @transform_3, window_bounds = array<i64: 128, 128>}, {pipeline_mode = #tpu.pipeline_mode<synchronous>, transform_indices = @transform_4, window_bounds = array<i64: 128, 128>}, {pipeline_mode = #tpu.pipeline_mode<synchronous>, transform_indices = @transform_5, window_bounds = array<i64: 128, 128>}, {transform_indices = @transform_6, window_bounds = array<i64: 16, 128>}]} {
    %c0 = arith.constant 0 : index
    %c0_0 = arith.constant 0 : index
    %0 = vector.load %arg1[%c0, %c0_0] : memref<16x128xf32, #tpu.memory_space<vmem>>, vector<16x128xf32>
    %c0_1 = arith.constant 0 : index
    %c0_2 = arith.constant 0 : index
    %1 = vector.load %arg2[%c0_1, %c0_2] : memref<128x256xf32, #tpu.memory_space<vmem>>, vector<128x256xf32>
    %cst = arith.constant dense<0.000000e+00> : vector<16x256xf32>
    %2 = tpu.matmul %0, %1, %cst {dimension_numbers = #tpu.dot_dimension_numbers<[1], [0], [0], [1], [0, 0, 1, 1], [], []>} : vector<16x128xf32>, vector<128x256xf32>, vector<16x256xf32> -> vector<16x256xf32>
    %3 = vector.extract_strided_slice %2 {offsets = [0, 0], sizes = [16, 128], strides = [1, 1]} : vector<16x256xf32> to vector<16x128xf32>
    %4 = vector.extract_strided_slice %2 {offsets = [0, 128], sizes = [16, 128], strides = [1, 1]} : vector<16x256xf32> to vector<16x128xf32>
    %c0_3 = arith.constant 0 : index
    %c0_4 = arith.constant 0 : index
    %5 = vector.load %arg3[%c0_3, %c0_4] : memref<128x128xf32, #tpu.memory_space<vmem>>, vector<128x128xf32>
    %cst_5 = arith.constant dense<0.000000e+00> : vector<16x128xf32>
    %6 = tpu.matmul %3, %5, %cst_5 {dimension_numbers = #tpu.dot_dimension_numbers<[1], [0], [0], [1], [0, 0, 1, 1], [], []>} : vector<16x128xf32>, vector<128x128xf32>, vector<16x128xf32> -> vector<16x128xf32>
    %c0_6 = arith.constant 0 : index
    %c0_7 = arith.constant 0 : index
    %7 = vector.load %arg4[%c0_6, %c0_7] : memref<128x128xf32, #tpu.memory_space<vmem>>, vector<128x128xf32>
    %cst_8 = arith.constant dense<0.000000e+00> : vector<16x128xf32>
    %8 = tpu.matmul %4, %7, %cst_8 {dimension_numbers = #tpu.dot_dimension_numbers<[1], [0], [0], [1], [0, 0, 1, 1], [], []>} : vector<16x128xf32>, vector<128x128xf32>, vector<16x128xf32> -> vector<16x128xf32>
    %9 = arith.negf %6 : vector<16x128xf32>
    %10 = math.exp %9 : vector<16x128xf32>
    %cst_9 = arith.constant 1.000000e+00 : f32
    %11 = vector.broadcast %cst_9 : f32 to vector<16x128xf32>
    %12 = arith.addf %11, %10 : vector<16x128xf32>
    %13 = arith.divf %11, %12 : vector<16x128xf32>
    %14 = arith.mulf %6, %13 : vector<16x128xf32>
    %15 = arith.mulf %14, %8 : vector<16x128xf32>
    %c0_10 = arith.constant 0 : index
    %c0_11 = arith.constant 0 : index
    %16 = vector.load %arg5[%c0_10, %c0_11] : memref<128x128xf32, #tpu.memory_space<vmem>>, vector<128x128xf32>
    %cst_12 = arith.constant dense<0.000000e+00> : vector<16x128xf32>
    %17 = tpu.matmul %15, %16, %cst_12 {dimension_numbers = #tpu.dot_dimension_numbers<[1], [0], [0], [1], [0, 0, 1, 1], [], []>} : vector<16x128xf32>, vector<128x128xf32>, vector<16x128xf32> -> vector<16x128xf32>
    %c0_13 = arith.constant 0 : index
    %c0_14 = arith.constant 0 : index
    %18 = vector.load %arg6[%c0_13, %c0_14] : memref<128x128xf32, #tpu.memory_space<vmem>>, vector<128x128xf32>
    %cst_15 = arith.constant dense<0.000000e+00> : vector<16x128xf32>
    %19 = tpu.matmul %17, %18, %cst_15 {dimension_numbers = #tpu.dot_dimension_numbers<[1], [0], [0], [1], [0, 0, 1, 1], [], []>} : vector<16x128xf32>, vector<128x128xf32>, vector<16x128xf32> -> vector<16x128xf32>
    %c0_16 = arith.constant 0 : index
    %c0_17 = arith.constant 0 : index
    %20 = vector.load %arg7[%c0_16, %c0_17] : memref<16x128xf32, #tpu.memory_space<vmem>>, vector<16x128xf32>
    tpu.vector_store %arg7[%c0_16, %c0_17], %19 {strides = array<i32>} : memref<16x128xf32, #tpu.memory_space<vmem>>, vector<16x128xf32>,
    return
  }
  func.func @transform_0(%arg0: i32) -> (i32, i32) {
    %c0_i32 = arith.constant 0 : i32
    %c0_i32_0 = arith.constant 0 : i32
    return %arg0, %c0_i32 : i32, i32
  }
  func.func @transform_1(%arg0: i32) -> (i32, i32) {
    %c0_i32 = arith.constant 0 : i32
    %c0_i32_0 = arith.constant 0 : i32
    %c0_i32_1 = arith.constant 0 : i32
    return %c0_i32, %c0_i32_0 : i32, i32
  }
  func.func @transform_2(%arg0: i32) -> (i32, i32) {
    %c0_i32 = arith.constant 0 : i32
    %c0_i32_0 = arith.constant 0 : i32
    %c0_i32_1 = arith.constant 0 : i32
    return %c0_i32, %c0_i32_0 : i32, i32
  }
  func.func @transform_3(%arg0: i32) -> (i32, i32) {
    %c0_i32 = arith.constant 0 : i32
    %c0_i32_0 = arith.constant 0 : i32
    %c0_i32_1 = arith.constant 0 : i32
    return %c0_i32, %c0_i32_0 : i32, i32
  }
  func.func @transform_4(%arg0: i32) -> (i32, i32) {
    %c0_i32 = arith.constant 0 : i32
    %c0_i32_0 = arith.constant 0 : i32
    %c0_i32_1 = arith.constant 0 : i32
    return %c0_i32, %c0_i32_0 : i32, i32
  }
  func.func @transform_5(%arg0: i32) -> (i32, i32) {
    %c0_i32 = arith.constant 0 : i32
    %c0_i32_0 = arith.constant 0 : i32
    %c0_i32_1 = arith.constant 0 : i32
    return %c0_i32, %c0_i32_0 : i32, i32
  }
  func.func @transform_6(%arg0: i32) -> (i32, i32) {
    %c0_i32 = arith.constant 0 : i32
    %c0_i32_0 = arith.constant 0 : i32
    return %arg0, %c0_i32 : i32, i32
  }
}

</mosaic_0001>

<bundles_post_ra>
// kernel: tpu_custom_call.1
= control target key start
LH: loop header
LB: loop body
LE: loop exit
PB: predicated region body
PF: predicated region fallthrough
CT: control target
= control target key end

     0   :  { %11 = vsyncpa [#allocation3], 0  ;;  %s1328_s0 = inlined_call_operand.hbm [shape: f32[16,128], index: 0, kind: input, shape index: {}]   ;;  %s1329_s1 = inlined_call_operand.hbm [shape: f32[128,256], index: 1, kind: input, shape index: {}]   ;;  %s1330_s2 = inlined_call_operand.hbm [shape: f32[128,128], index: 2, kind: input, shape index: {}]   ;;  %s1331_s3 = inlined_call_operand.hbm [shape: f32[128,128], index: 3, kind: input, shape index: {}]   ;;  %s1332_s4 = inlined_call_operand.hbm [shape: f32[128,128], index: 4, kind: input, shape index: {}]   ;;  %s1333_s5 = inlined_call_operand.hbm [shape: f32[128,128], index: 5, kind: input, shape index: {}]   ;;  %s1334_s6 = inlined_call_operand.hbm [shape: f32[16,128], index: 6, kind: output, shape index: {}]  }
   0x1   :  { %12 = vsyncpa [#allocation6], 0 }
   0x2   :  { %13 = vsyncpa [#allocation9], 0 }
   0x3   :  { %14 = vsyncpa [#allocation12], 0 }
   0x4   :  { %15 = vsyncpa [#allocation4], 0  ;;  %s1177_s21 = smov [#allocation5]   ;;  %s1013_s25 = scalar_lea.hbm %s1329_s1, 4096 }
   0x5   :  { %s33_s22 = sshll.u32 %s1177_s21, 4  ;;  %p1014_p0 = scmp.ne.s32.totalorder %s1329_s1, %s1013_s25  ;;  %s34_s22 = int_to_ptr.vmem [resolvable:$true] %s33_s22 }
   0x6   :  { %p1017_p1 = scmp.lt.u32.totalorder %s1013_s25, %s1329_s1 }
   0x8   :  { %p1019_p2 = pnand %p1017_p1, %p1014_p0 }
   0xa   :  { %1022 = shalt.err (!%p1019_p2)
}
   0xb   :  { %s1023_s30 = scalar_lea.vmem %s34_s22, 4096  ;;  %p1028_p4 = scmp.lt.s32.totalorder %s34_s22, %s34_s22 }
   0xc   :  { %p1024_p3 = scmp.ne.s32.totalorder %s34_s22, %s1023_s30  ;;  %p1029_p5 = scmp.lt.s32.totalorder %s1023_s30, %s1023_s30 }
   0xe   :  { %p1030_p6 = por %p1029_p5, %p1028_p4 }
  0x10   :  { %p1031_p7 = pnand %p1030_p6, %p1024_p3 }
  0x12   :  { %1034 = shalt.err (!%p1031_p7)
}
  0x13   :  { %s1178_s7 = smov 256   ;;  %s1179_s8 = smov 16  }
  0x14   :  { %39 = dma.hbm_to_vmem [thread:$0]  %s1329_s1, 4096, %s34_s22, [#allocation6], %s1178_s7, %s1178_s7, %s1179_s8  }
  0x15   :  { %s1180_s11 = smov [#allocation8]   ;;  %s1181_s13 = smov [#allocation2]  }
  0x16   :  { %s57_s12 = sshll.u32 %s1180_s11, 4  ;;  %s21_s14 = sshll.u32 %s1181_s13, 4  ;;  %s58_s12 = int_to_ptr.vmem [resolvable:$true] %s57_s12  ;;  %s22_s14 = int_to_ptr.vmem [resolvable:$true] %s21_s14 }
  0x17   :  { %s1035_s17 = scalar_lea.hbm %s1331_s3, 2048 }
  0x18   :  { %p1036_p8 = scmp.ne.s32.totalorder %s1331_s3, %s1035_s17  ;;  %p1039_p9 = scmp.lt.u32.totalorder %s1035_s17, %s1331_s3 }
  0x1a   :  { %p1041_p10 = pnand %p1039_p9, %p1036_p8 }
  0x1c   :  { %1044 = shalt.err (!%p1041_p10)
}
  0x1d   :  { %s1045_s1 = scalar_lea.vmem %s58_s12, 2048  ;;  %p1050_p12 = scmp.lt.s32.totalorder %s58_s12, %s58_s12 }
  0x1e   :  { %p1046_p11 = scmp.ne.s32.totalorder %s58_s12, %s1045_s1  ;;  %p1051_p13 = scmp.lt.s32.totalorder %s1045_s1, %s1045_s1 }
  0x20   :  { %p1052_p0 = por %p1051_p13, %p1050_p12 }
  0x22   :  { %p1053_p1 = pnand %p1052_p0, %p1046_p11 }
  0x24   :  { %1056 = shalt.err (!%p1053_p1)
}
  0x25   :  { %s1182_s22 = smov 128   ;;  %s1183_s23 = smov 8  }
  0x26   :  { %63 = dma.hbm_to_vmem [thread:$0]  %s1331_s3, 2048, %s58_s12, [#allocation9], %s1182_s22, %s1182_s22, %s1183_s23  }
  0x27   :  { %s1057_s28 = scalar_lea.hbm %s1328_s0, 256 }
  0x28   :  { %p1058_p2 = scmp.ne.s32.totalorder %s1328_s0, %s1057_s28  ;;  %p1061_p3 = scmp.lt.u32.totalorder %s1057_s28, %s1328_s0 }
  0x2a   :  { %p1063_p4 = pnand %p1061_p3, %p1058_p2 }
  0x2c   :  { %1066 = shalt.err (!%p1063_p4)
}
  0x2d   :  { %s1067_s9 = scalar_lea.vmem %s22_s14, 256  ;;  %p1072_p6 = scmp.lt.s32.totalorder %s22_s14, %s22_s14 }
  0x2e   :  { %p1068_p5 = scmp.ne.s32.totalorder %s22_s14, %s1067_s9  ;;  %p1073_p7 = scmp.lt.s32.totalorder %s1067_s9, %s1067_s9 }
  0x30   :  { %p1074_p8 = por %p1073_p7, %p1072_p6 }
  0x32   :  { %p1075_p9 = pnand %p1074_p8, %p1068_p5 }
  0x34   :  { %1078 = shalt.err (!%p1075_p9)
}
  0x35   :  { %27 = dma.hbm_to_vmem [thread:$0]  %s1328_s0, 256, %s22_s14, [#allocation3], %s1182_s22, %s1182_s22, %s1183_s23  }
  0x36   :  { %s1184_s11 = smov [#allocation7]   ;;  %s1185_s13 = smov [#allocation10]  }
  0x37   :  { %s45_s12 = sshll.u32 %s1184_s11, 4  ;;  %s69_s15 = sshll.u32 %s1185_s13, 4  ;;  %s46_s12 = int_to_ptr.vmem [resolvable:$true] %s45_s12  ;;  %s70_s15 = int_to_ptr.vmem [resolvable:$true] %s69_s15 }
  0x38   :  { %s1079_s18 = scalar_lea.hbm %s1330_s2, 2048 }
  0x39   :  { %p1080_p10 = scmp.ne.s32.totalorder %s1330_s2, %s1079_s18  ;;  %p1083_p11 = scmp.lt.u32.totalorder %s1079_s18, %s1330_s2 }
  0x3b   :  { %p1085_p12 = pnand %p1083_p11, %p1080_p10 }
  0x3d   :  { %1088 = shalt.err (!%p1085_p12)
}
  0x3e   :  { %s1089_s0 = scalar_lea.vmem %s46_s12, 2048  ;;  %p1094_p0 = scmp.lt.s32.totalorder %s46_s12, %s46_s12 }
  0x3f   :  { %p1090_p13 = scmp.ne.s32.totalorder %s46_s12, %s1089_s0  ;;  %p1095_p1 = scmp.lt.s32.totalorder %s1089_s0, %s1089_s0 }
  0x41   :  { %p1096_p2 = por %p1095_p1, %p1094_p0 }
  0x43   :  { %p1097_p3 = pnand %p1096_p2, %p1090_p13 }
  0x45   :  { %1100 = shalt.err (!%p1097_p3)
}
  0x46   :  { %51 = dma.hbm_to_vmem [thread:$0]  %s1330_s2, 2048, %s46_s12, [#allocation6], %s1182_s22, %s1182_s22, %s1183_s23  }
  0x47   :  { %s1101_s27 = scalar_lea.hbm %s1332_s4, 2048 }
  0x48   :  { %p1102_p4 = scmp.ne.s32.totalorder %s1332_s4, %s1101_s27  ;;  %p1105_p5 = scmp.lt.u32.totalorder %s1101_s27, %s1332_s4 }
  0x4a   :  { %p1107_p6 = pnand %p1105_p5, %p1102_p4 }
  0x4c   :  { %1110 = shalt.err (!%p1107_p6)
}
  0x4d   :  { %s1111_s8 = scalar_lea.vmem %s70_s15, 2048  ;;  %p1116_p8 = scmp.lt.s32.totalorder %s70_s15, %s70_s15 }
  0x4e   :  { %p1112_p7 = scmp.ne.s32.totalorder %s70_s15, %s1111_s8  ;;  %p1117_p9 = scmp.lt.s32.totalorder %s1111_s8, %s1111_s8 }
  0x50   :  { %p1118_p10 = por %p1117_p9, %p1116_p8 }
  0x52   :  { %p1119_p11 = pnand %p1118_p10, %p1112_p7 }
  0x54   :  { %1122 = shalt.err (!%p1119_p11)
}
  0x55   :  { %75 = dma.hbm_to_vmem [thread:$0]  %s1332_s4, 2048, %s70_s15, [#allocation9], %s1182_s22, %s1182_s22, %s1183_s23  }
  0x56   :  { %s1186_s3 = smov [#allocation11]   ;;  %s1123_s13 = scalar_lea.hbm %s1333_s5, 2048 }
  0x57   :  { %s81_s10 = sshll.u32 %s1186_s3, 4  ;;  %p1124_p12 = scmp.ne.s32.totalorder %s1333_s5, %s1123_s13  ;;  %s82_s10 = int_to_ptr.vmem [resolvable:$true] %s81_s10 }
  0x58   :  { %p1127_p13 = scmp.lt.u32.totalorder %s1123_s13, %s1333_s5 }
  0x5a   :  { %p1129_p0 = pnand %p1127_p13, %p1124_p12 }
  0x5c   :  { %1132 = shalt.err (!%p1129_p0)
}
  0x5d   :  { %s1133_s20 = scalar_lea.vmem %s82_s10, 2048  ;;  %p1138_p2 = scmp.lt.s32.totalorder %s82_s10, %s82_s10 }
  0x5e   :  { %p1134_p1 = scmp.ne.s32.totalorder %s82_s10, %s1133_s20  ;;  %p1139_p3 = scmp.lt.s32.totalorder %s1133_s20, %s1133_s20 }
  0x60   :  { %p1140_p4 = por %p1139_p3, %p1138_p2 }
  0x62   :  { %p1141_p5 = pnand %p1140_p4, %p1134_p1 }
  0x64   :  { %1144 = shalt.err (!%p1141_p5)
}
  0x65   :  { %87 = dma.hbm_to_vmem [thread:$0]  %s1333_s5, 2048, %s82_s10, [#allocation12], %s1182_s22, %s1182_s22, %s1183_s23  }
  0x66   :  { %1167 = dma.done.wait [#allocation3], 256  }
  0x67   :  { %1168 = vsyncadd [#allocation3], 4294967040 }
  0x68   :  { %1169 = dma.done.wait [#allocation6], 6144  }
  0x69   :  { %1170 = vsyncadd [#allocation6], 4294961152 }
  0x6a   :  { %1171 = dma.done.wait [#allocation9], 4096  }
  0x6b   :  { %1172 = vsyncadd [#allocation9], 4294963200 }
  0x6c   :  { %1173 = dma.done.wait [#allocation12], 2048  }
  0x6d   :  { %1174 = vsyncadd [#allocation12], 4294965248  ;;  %v1187_v0 = vmov 0.0   ;;  %v109_v1 = vld [vmem:[#allocation5 + $0x8] sm:$0xff]  ;;  %v111_v2 = vld [vmem:[#allocation5 + $0x18] sm:$0xff]  ;;  %s1188_s5 = smov [#allocation13]  }
  0x6e   :  { %204 = vmatprep.mubr.f32.mxu0 %v1187_v0  ;;  %v108_v3 = vld [vmem:[#allocation5] sm:$0xff]  ;;  %v833_v4 = vpack.c.bf16 %v111_v2, %v109_v1  ;;  %v110_v5 = vld [vmem:[#allocation5 + $0x10] sm:$0xff]  ;;  %v113_v6 = vld [vmem:[#allocation5 + $0x28] sm:$0xff]  ;;  %s604_s21 = sshll.u32 %s1188_s5, 4  ;;  %s605_s21 = int_to_ptr.vmem [resolvable:$true] %s604_s21 }
  0x6f   :  { %v115_v7 = vld [vmem:[#allocation5 + $0x38] sm:$0xff]  ;;  %v835_v8 = vpack.c.bf16 %v110_v5, %v108_v3  ;;  %v112_v10 = vld [vmem:[#allocation5 + $0x20] sm:$0xff]  ;;  %v114_v11 = vld [vmem:[#allocation5 + $0x30] sm:$0xff]  ;;  %s1145_s1 = scalar_lea.vmem %s605_s21, 256  ;;  %p1150_p7 = scmp.lt.s32.totalorder %s605_s21, %s605_s21 }
  0x70   :  { %v837_v9 = vpack.c.bf16 %v115_v7, %v113_v6  ;;  %v117_v12 = vld [vmem:[#allocation5 + $0x48] sm:$0xff]  ;;  %834 = vmatprep.subr.bf16.mxu0 %v833_v4  ;;  %v119_v13 = vld [vmem:[#allocation5 + $0x58] sm:$0xff]  ;;  %v839_v14 = vpack.c.bf16 %v114_v11, %v112_v10  ;;  %v116_v16 = vld [vmem:[#allocation5 + $0x40] sm:$0xff]  ;;  %p1146_p6 = scmp.ne.s32.totalorder %s605_s21, %s1145_s1  ;;  %p1151_p8 = scmp.lt.s32.totalorder %s1145_s1, %s1145_s1 }
  0x71   :  { %836 = vmatpush1.bf16.msra.mxu0 %v835_v8  ;;  %v841_v15 = vpack.c.bf16 %v119_v13, %v117_v12  ;;  %v118_v17 = vld [vmem:[#allocation5 + $0x50] sm:$0xff]  ;;  %v121_v18 = vld [vmem:[#allocation5 + $0x68] sm:$0xff]  ;;  %v123_v19 = vld [vmem:[#allocation5 + $0x78] sm:$0xff] }
  0x72   :  { %838 = vmatprep.subr.bf16.mxu0 %v837_v9  ;;  %v843_v20 = vpack.c.bf16 %v118_v17, %v116_v16  ;;  %v845_v21 = vpack.c.bf16 %v123_v19, %v121_v18  ;;  %v120_v22 = vld [vmem:[#allocation5 + $0x60] sm:$0xff]  ;;  %v122_v23 = vld [vmem:[#allocation5 + $0x70] sm:$0xff]  ;;  %v125_v24 = vld [vmem:[#allocation5 + $0x88] sm:$0xff]  ;;  %p1152_p9 = por %p1151_p8, %p1150_p7 }
  0x73   :  { %v127_v25 = vld [vmem:[#allocation5 + $0x98] sm:$0xff]  ;;  %v217_v26 = vld [vmem:[#allocation7] sm:$0xff]  ;;  %v218_v27 = vld [vmem:[#allocation7 + $0x8] sm:$0xff]  ;;  %v847_v28 = vpack.c.bf16 %v122_v23, %v120_v22 }
  0x74   :  { %v124_v29 = vld [vmem:[#allocation5 + $0x80] sm:$0xff]  ;;  %v865_v30 = vpack.c.bf16 %v218_v27, %v217_v26  ;;  %v219_v31 = vld [vmem:[#allocation7 + $0x10] sm:$0xff]  ;;  %v849_v32 = vpack.c.bf16 %v127_v25, %v125_v24  ;;  %v129_v34 = vld [vmem:[#allocation5 + $0xa8] sm:$0xff]  ;;  %p1153_p10 = pnand %p1152_p9, %p1146_p6 }
  0x75   :  { %840 = vmatpush1.bf16.msra.mxu0 %v839_v14  ;;  %v126_v33 = vld [vmem:[#allocation5 + $0x90] sm:$0xff]  ;;  %v220_v35 = vld [vmem:[#allocation7 + $0x18] sm:$0xff]  ;;  %v221_v38 = vld [vmem:[#allocation7 + $0x20] sm:$0xff] }
  0x76   :  { %842 = vmatprep.subr.bf16.mxu0 %v841_v15  ;;  %v131_v36 = vld [vmem:[#allocation5 + $0xb8] sm:$0xff]  ;;  %866 = vmatprep.subr.bf16.mxu1 %v865_v30  ;;  %v869_v37 = vpack.c.bf16 %v220_v35, %v219_v31  ;;  %v222_v39 = vld [vmem:[#allocation7 + $0x28] sm:$0xff]  ;;  %v851_v40 = vpack.c.bf16 %v126_v33, %v124_v29  ;;  %v128_v41 = vld [vmem:[#allocation5 + $0xa0] sm:$0xff] }
  0x77   :  { %868 = vmatpush3.bf16.msra.mxu1 %v865_v30  ;;  %v873_v42 = vpack.c.bf16 %v222_v39, %v221_v38  ;;  %v853_v43 = vpack.c.bf16 %v131_v36, %v129_v34  ;;  %v130_v44 = vld [vmem:[#allocation5 + $0xb0] sm:$0xff]  ;;  %v224_v46 = vld [vmem:[#allocation7 + $0x38] sm:$0xff]  ;;  %v133_v47 = vld [vmem:[#allocation5 + $0xc8] sm:$0xff] }
  0x78   :  { %870 = vmatprep.subr.bf16.mxu1 %v869_v37  ;;  %v223_v45 = vld [vmem:[#allocation7 + $0x30] sm:$0xff]  ;;  %v135_v48 = vld [vmem:[#allocation5 + $0xd8] sm:$0xff]  ;;  %v855_v49 = vpack.c.bf16 %v130_v44, %v128_v41  ;;  %v132_v50 = vld [vmem:[#allocation5 + $0xc0] sm:$0xff] }
  0x79   :  { %844 = vmatpush1.bf16.msra.mxu0 %v843_v20  ;;  %v877_v51 = vpack.c.bf16 %v224_v46, %v223_v45  ;;  %v857_v52 = vpack.c.bf16 %v135_v48, %v133_v47  ;;  %v134_v53 = vld [vmem:[#allocation5 + $0xd0] sm:$0xff]  ;;  %v225_v54 = vld [vmem:[#allocation7 + $0x40] sm:$0xff]  ;;  %v226_v55 = vld [vmem:[#allocation7 + $0x48] sm:$0xff] }
  0x7a   :  { %846 = vmatprep.subr.bf16.mxu0 %v845_v21  ;;  %v137_v56 = vld [vmem:[#allocation5 + $0xe8] sm:$0xff]  ;;  %v139_v57 = vld [vmem:[#allocation5 + $0xf8] sm:$0xff]  ;;  %v859_v58 = vpack.c.bf16 %v134_v53, %v132_v50  ;;  %v136_v59 = vld [vmem:[#allocation5 + $0xe0] sm:$0xff]  ;;  %v881_v60 = vpack.c.bf16 %v226_v55, %v225_v54 }
  0x7b   :  { %872 = vmatpush3.bf16.msra.mxu1 %v869_v37  ;;  %v861_v61 = vpack.c.bf16 %v139_v57, %v137_v56  ;;  %v138_v62 = vld [vmem:[#allocation5 + $0xf0] sm:$0xff]  ;;  %v228_v1 = vld [vmem:[#allocation7 + $0x58] sm:$0xff]  ;;  %v308_v2 = vld [vmem:[#allocation8] sm:$0xff] }
  0x7c   :  { %874 = vmatprep.subr.bf16.mxu1 %v873_v42  ;;  %v227_v63 = vld [vmem:[#allocation7 + $0x50] sm:$0xff]  ;;  %v309_v3 = vld [vmem:[#allocation8 + $0x8] sm:$0xff]  ;;  %v863_v4 = vpack.c.bf16 %v138_v62, %v136_v59  ;;  %v311_v8 = vld [vmem:[#allocation8 + $0x18] sm:$0xff] }
  0x7d   :  { %848 = vmatpush1.bf16.msra.mxu0 %v847_v28  ;;  %v885_v5 = vpack.c.bf16 %v228_v1, %v227_v63  ;;  %v897_v6 = vpack.c.bf16 %v309_v3, %v308_v2  ;;  %v310_v7 = vld [vmem:[#allocation8 + $0x10] sm:$0xff]  ;;  %v229_v9 = vld [vmem:[#allocation7 + $0x60] sm:$0xff]  ;;  %v230_v10 = vld [vmem:[#allocation7 + $0x68] sm:$0xff] }
  0x7e   :  { %850 = vmatprep.subr.bf16.mxu0 %v849_v32  ;;  %v106_v11 = vld [vmem:[#allocation2] sm:$0xff]  ;;  %v901_v12 = vpack.c.bf16 %v311_v8, %v310_v7  ;;  %v889_v13 = vpack.c.bf16 %v230_v10, %v229_v9  ;;  %v312_v14 = vld [vmem:[#allocation8 + $0x20] sm:$0xff]  ;;  %v313_v15 = vld [vmem:[#allocation8 + $0x28] sm:$0xff] }
  0x7f   :  { %876 = vmatpush3.bf16.msra.mxu1 %v873_v42  ;;  %v107_v16 = vld [vmem:[#allocation2 + $0x8] sm:$0xff]  ;;  %v905_v17 = vpack.c.bf16 %v313_v15, %v312_v14  ;;  %v314_v18 = vld [vmem:[#allocation8 + $0x30] sm:$0xff]  ;;  %v316_v21 = vld [vmem:[#allocation8 + $0x40] sm:$0xff] }
  0x80   :  { %878 = vmatprep.subr.bf16.mxu1 %v877_v51  ;;  %v315_v19 = vld [vmem:[#allocation8 + $0x38] sm:$0xff]  ;;  %v317_v22 = vld [vmem:[#allocation8 + $0x48] sm:$0xff]  ;;  %v318_v24 = vld [vmem:[#allocation8 + $0x50] sm:$0xff] }
  0x81   :  { %852 = vmatpush1.bf16.msra.mxu0 %v851_v40  ;;  %v909_v20 = vpack.c.bf16 %v315_v19, %v314_v18  ;;  %v913_v23 = vpack.c.bf16 %v317_v22, %v316_v21  ;;  %v319_v25 = vld [vmem:[#allocation8 + $0x58] sm:$0xff]  ;;  %v320_v26 = vld [vmem:[#allocation8 + $0x60] sm:$0xff]  ;;  %v321_v27 = vld [vmem:[#allocation8 + $0x68] sm:$0xff] }
  0x82   :  { %854 = vmatprep.subr.bf16.mxu0 %v853_v43  ;;  %v921_v28 = vpack.c.bf16 %v321_v27, %v320_v26  ;;  %v231_v29 = vld [vmem:[#allocation7 + $0x70] sm:$0xff]  ;;  %v232_v30 = vld [vmem:[#allocation7 + $0x78] sm:$0xff]  ;;  %v415_v39 = vld [vmem:[#allocation10] sm:$0xff] }
  0x83   :  { %880 = vmatpush3.bf16.msra.mxu1 %v877_v51  ;;  %v893_v31 = vpack.c.bf16 %v232_v30, %v231_v29  ;;  %v322_v32 = vld [vmem:[#allocation8 + $0x70] sm:$0xff]  ;;  %v323_v33 = vld [vmem:[#allocation8 + $0x78] sm:$0xff]  ;;  %v416_v40 = vld [vmem:[#allocation10 + $0x8] sm:$0xff] }
  0x84   :  { %882 = vmatprep.subr.bf16.mxu1 %v881_v60  ;;  %v925_v34 = vpack.c.bf16 %v323_v33, %v322_v32  ;;  %v929_v41 = vpack.c.bf16 %v416_v40, %v415_v39  ;;  %v417_v42 = vld [vmem:[#allocation10 + $0x10] sm:$0xff]  ;;  %v418_v43 = vld [vmem:[#allocation10 + $0x18] sm:$0xff]  ;;  %v419_v45 = vld [vmem:[#allocation10 + $0x20] sm:$0xff] }
  0x85   :  { %856 = vmatpush1.bf16.msra.mxu0 %v855_v49  ;;  %v933_v44 = vpack.c.bf16 %v418_v43, %v417_v42  ;;  %v420_v46 = vld [vmem:[#allocation10 + $0x28] sm:$0xff]  ;;  %v421_v48 = vld [vmem:[#allocation10 + $0x30] sm:$0xff]  ;;  %v422_v49 = vld [vmem:[#allocation10 + $0x38] sm:$0xff] }
  0x86   :  { %858 = vmatprep.subr.bf16.mxu0 %v857_v52  ;;  %v937_v47 = vpack.c.bf16 %v420_v46, %v419_v45  ;;  %v941_v50 = vpack.c.bf16 %v422_v49, %v421_v48  ;;  %v423_v51 = vld [vmem:[#allocation10 + $0x40] sm:$0xff]  ;;  %v424_v52 = vld [vmem:[#allocation10 + $0x48] sm:$0xff]  ;;  %v425_v54 = vld [vmem:[#allocation10 + $0x50] sm:$0xff] }
  0x87   :  { %884 = vmatpush3.bf16.msra.mxu1 %v881_v60  ;;  %v945_v53 = vpack.c.bf16 %v424_v52, %v423_v51  ;;  %v426_v55 = vld [vmem:[#allocation10 + $0x58] sm:$0xff]  ;;  %v427_v57 = vld [vmem:[#allocation10 + $0x60] sm:$0xff]  ;;  %v429_v60 = vld [vmem:[#allocation10 + $0x70] sm:$0xff] }
  0x88   :  { %886 = vmatprep.subr.bf16.mxu1 %v885_v5  ;;  %v949_v56 = vpack.c.bf16 %v426_v55, %v425_v54  ;;  %v506_v63 = vld [vmem:[#allocation11] sm:$0xff]  ;;  %v507_v1 = vld [vmem:[#allocation11 + $0x8] sm:$0xff]  ;;  %v508_v2 = vld [vmem:[#allocation11 + $0x10] sm:$0xff] }
  0x89   :  { %860 = vmatpush1.bf16.msra.mxu0 %v859_v58  ;;  %v428_v58 = vld [vmem:[#allocation10 + $0x68] sm:$0xff]  ;;  %v961_v3 = vpack.c.bf16 %v507_v1, %v506_v63  ;;  %v512_v9 = vld [vmem:[#allocation11 + $0x30] sm:$0xff]  ;;  %v513_v10 = vld [vmem:[#allocation11 + $0x38] sm:$0xff] }
  0x8a   :  { %862 = vmatprep.subr.bf16.mxu0 %v861_v61  ;;  %v953_v59 = vpack.c.bf16 %v428_v58, %v427_v57  ;;  %v430_v61 = vld [vmem:[#allocation10 + $0x78] sm:$0xff]  ;;  %v511_v7 = vld [vmem:[#allocation11 + $0x28] sm:$0xff]  ;;  %v516_v15 = vld [vmem:[#allocation11 + $0x50] sm:$0xff] }
  0x8b   :  { %888 = vmatpush3.bf16.msra.mxu1 %v885_v5  ;;  %v957_v62 = vpack.c.bf16 %v430_v61, %v429_v60  ;;  %v518_v18 = vld [vmem:[#allocation11 + $0x60] sm:$0xff]  ;;  %v519_v19 = vld [vmem:[#allocation11 + $0x68] sm:$0xff]  ;;  %v520_v21 = vld [vmem:[#allocation11 + $0x70] sm:$0xff] }
  0x8c   :  { %890 = vmatprep.subr.bf16.mxu1 %v889_v13  ;;  %v521_v22 = vld [vmem:[#allocation11 + $0x78] sm:$0xff] }
  0x8d   :  { %864 = vmatpush1.bf16.msra.mxu0 %v863_v4  ;;  %v509_v4 = vld [vmem:[#allocation11 + $0x18] sm:$0xff] }
  0x8e   :  { %898 = vmatprep.subr.bf16.mxu0 %v897_v6  ;;  %v965_v5 = vpack.c.bf16 %v509_v4, %v508_v2 }
  0x8f   :  { %892 = vmatpush3.bf16.msra.mxu1 %v889_v13  ;;  %v515_v13 = vld [vmem:[#allocation11 + $0x48] sm:$0xff] }
  0x90   :  { %205 = vmatmul.mubr.f32.vlgmr.msra.gmra.mrb[0].mxu0 %v106_v11  ;;  %894 = vmatprep.subr.bf16.mxu1 %v893_v31  ;;  %v973_v11 = vpack.c.bf16 %v513_v10, %v512_v9 }
  0x91   :  { %210 = vmatprep.mubr.f32.mxu0 %v1187_v0  ;;  %900 = vmatpush3.bf16.msra.mxu0 %v897_v6  ;;  %v917_v0 = vpack.c.bf16 %v319_v25, %v318_v24  ;;  %v510_v6 = vld [vmem:[#allocation11 + $0x20] sm:$0xff] }
  0x92   :  { %902 = vmatprep.subr.bf16.mxu0 %v901_v12  ;;  %v969_v8 = vpack.c.bf16 %v511_v7, %v510_v6 }
  0x93   :  { %896 = vmatpush3.bf16.msra.mxu1 %v893_v31 }
  0x94   :  { %211 = vmatmul.mubr.f32.gmra.mrb[2].mxu0 %v107_v16  ;;  %930 = vmatprep.subr.bf16.mxu1 %v929_v41  ;;  %v517_v16 = vld [vmem:[#allocation11 + $0x58] sm:$0xff] }
  0x95   :  { %904 = vmatpush3.bf16.msra.mxu0 %v901_v12  ;;  %v514_v12 = vld [vmem:[#allocation11 + $0x40] sm:$0xff] }
  0x96   :  { %906 = vmatprep.subr.bf16.mxu0 %v905_v17  ;;  %v977_v14 = vpack.c.bf16 %v515_v13, %v514_v12 }
  0x99   :  { %908 = vmatpush3.bf16.msra.mxu0 %v905_v17  ;;  %v981_v17 = vpack.c.bf16 %v517_v16, %v516_v15 }
  0x9a   :  { %910 = vmatprep.subr.bf16.mxu0 %v909_v20 }
  0x9d   :  { %912 = vmatpush3.bf16.msra.mxu0 %v909_v20  ;;  %v985_v20 = vpack.c.bf16 %v519_v19, %v518_v18 }
  0x9e   :  { %914 = vmatprep.subr.bf16.mxu0 %v913_v23 }
  0xa1   :  { %916 = vmatpush3.bf16.msra.mxu0 %v913_v23  ;;  %v989_v23 = vpack.c.bf16 %v521_v22, %v520_v21 }
  0xa2   :  { %918 = vmatprep.subr.bf16.mxu0 %v917_v0 }
  0xa5   :  { %920 = vmatpush3.bf16.msra.mxu0 %v917_v0 }
  0xa6   :  { %922 = vmatprep.subr.bf16.mxu0 %v921_v28 }
  0xa9   :  { %924 = vmatpush3.bf16.msra.mxu0 %v921_v28 }
  0xaa   :  { %926 = vmatprep.subr.bf16.mxu0 %v925_v34 }
  0xad   :  { %928 = vmatpush3.bf16.msra.mxu0 %v925_v34 }
  0xae   :  { %962 = vmatprep.subr.bf16.mxu0 %v961_v3 }
 0x163   :  { %v206_v35 = vpop.f32.mrb[0].mxu0 }
 0x164   :  { %v208_v36 = vpop.f32.mrb[1].mxu0  ;;  %725 = vmatprep.mubr.f32.mxu1 %v206_v35 }
 0x165   :  { %760 = vmatprep.mubr.f32.mxu0 %v208_v36 }
 0x167   :  { %v212_v37 = vpop.f32.mrb[2].mxu0 }
 0x168   :  { %v214_v38 = vpop.f32.mrb[3].mxu0  ;;  %726 = vmatmul.mubr.f32.vlgmr.msra.gmra.mrb[0].mxu1 %v212_v37 }
 0x169   :  { %761 = vmatmul.mubr.f32.vlgmr.msra.gmra.mrb[4].mxu0 %v214_v38  ;;  %932 = vmatpush3.bf16.msra.mxu1 %v929_v41 }
 0x16a   :  { %934 = vmatprep.subr.bf16.mxu1 %v933_v44  ;;  %964 = vmatpush3.bf16.msra.mxu0 %v961_v3 }
 0x16b   :  { %966 = vmatprep.subr.bf16.mxu0 %v965_v5 }
 0x16d   :  { %936 = vmatpush3.bf16.msra.mxu1 %v933_v44 }
 0x16e   :  { %938 = vmatprep.subr.bf16.mxu1 %v937_v47  ;;  %968 = vmatpush3.bf16.msra.mxu0 %v965_v5 }
 0x16f   :  { %970 = vmatprep.subr.bf16.mxu0 %v969_v8 }
 0x171   :  { %940 = vmatpush3.bf16.msra.mxu1 %v937_v47 }
 0x172   :  { %942 = vmatprep.subr.bf16.mxu1 %v941_v50  ;;  %972 = vmatpush3.bf16.msra.mxu0 %v969_v8 }
 0x173   :  { %974 = vmatprep.subr.bf16.mxu0 %v973_v11 }
 0x175   :  { %944 = vmatpush3.bf16.msra.mxu1 %v941_v50 }
 0x176   :  { %946 = vmatprep.subr.bf16.mxu1 %v945_v53  ;;  %976 = vmatpush3.bf16.msra.mxu0 %v973_v11 }
 0x177   :  { %978 = vmatprep.subr.bf16.mxu0 %v977_v14 }
 0x179   :  { %948 = vmatpush3.bf16.msra.mxu1 %v945_v53 }
 0x17a   :  { %950 = vmatprep.subr.bf16.mxu1 %v949_v56  ;;  %980 = vmatpush3.bf16.msra.mxu0 %v977_v14 }
 0x17b   :  { %982 = vmatprep.subr.bf16.mxu0 %v981_v17 }
 0x17d   :  { %952 = vmatpush3.bf16.msra.mxu1 %v949_v56 }
 0x17e   :  { %954 = vmatprep.subr.bf16.mxu1 %v953_v59  ;;  %984 = vmatpush3.bf16.msra.mxu0 %v981_v17 }
 0x17f   :  { %986 = vmatprep.subr.bf16.mxu0 %v985_v20 }
 0x181   :  { %956 = vmatpush3.bf16.msra.mxu1 %v953_v59 }
 0x182   :  { %958 = vmatprep.subr.bf16.mxu1 %v957_v62  ;;  %988 = vmatpush3.bf16.msra.mxu0 %v985_v20 }
 0x183   :  { %990 = vmatprep.subr.bf16.mxu0 %v989_v23 }
 0x185   :  { %960 = vmatpush3.bf16.msra.mxu1 %v957_v62 }
 0x186   :  { %992 = vmatpush3.bf16.msra.mxu0 %v989_v23 }
 0x23b   :  { %v727_v24 = vpop.f32.mrb[0].mxu1 }
 0x23c   :  { %v620_v25 = vmul.f32 -1.442695, %v727_v24  ;;  %v299_v0 = vpop.f32.mrb[1].mxu1  ;;  %v762_v26 = vpop.f32.mrb[4].mxu0 }
 0x23d   :  { %v619_v27 = vmul.f32 -1.442695, %v299_v0  ;;  %v390_v28 = vpop.f32.mrb[5].mxu0 }
 0x23e   :  { %1005 = vpow2.f32 %v620_v25 }
 0x23f   :  { %1007 = vpow2.f32 %v619_v27 }
 0x248   :  { %v1006_v29 = vpop.eup %1005 }
 0x249   :  { %v1008_v30 = vpop.eup %1007  ;;  %v406_v31 = vadd.f32 1.0, %v1006_v29 }
 0x24a   :  { %v405_v32 = vadd.f32 1.0, %v1008_v30 }
 0x24b   :  { %1009 = vrcp.f32 %v406_v31 }
 0x24c   :  { %1011 = vrcp.f32 %v405_v32 }
 0x255   :  { %v1010_v33 = vpop.eup %1009 }
 0x256   :  { %v1012_v34 = vpop.eup %1011  ;;  %v412_v35 = vmul.f32 %v1010_v33, %v727_v24 }
 0x257   :  { %v411_v36 = vmul.f32 %v1012_v34, %v299_v0 }
 0x258   :  { %v414_v37 = vmul.f32 %v762_v26, %v412_v35 }
 0x259   :  { %v413_v38 = vmul.f32 %v411_v36, %v390_v28 }
 0x25b   :  { %795 = vmatprep.mubr.f32.mxu1 %v413_v38 }
 0x25c   :  { %796 = vmatmul.mubr.f32.vlgmr.msra.gmra.mrb[2].mxu1 %v414_v37 }
 0x32f   :  { %v797_v39 = vpop.f32.mrb[2].mxu1 }
 0x330   :  { %v497_v40 = vpop.f32.mrb[3].mxu1 }
 0x331   :  { %830 = vmatprep.mubr.f32.mxu0 %v497_v40 }
 0x332   :  { %831 = vmatmul.mubr.f32.vlgmr.msra.gmra.mrb[6].mxu0 %v797_v39 }
 0x405   :  { %v832_v41 = vpop.f32.mrb[6].mxu0 }
 0x406   :  { %598 = vst [vmem:[#allocation13 + $0x8] sm:$0xff] %v832_v41  ;;  %v588_v42 = vpop.f32.mrb[7].mxu0 }
 0x407   :  { %597 = vst [vmem:[#allocation13] sm:$0xff] %v588_v42 }
 0x408   :  { %1156 = shalt.err (!%p1153_p10)
}
 0x409   :  { %s1157_s24 = scalar_lea.hbm %s1334_s6, 256 }
 0x40a   :  { %p1158_p11 = scmp.ne.s32.totalorder %s1334_s6, %s1157_s24  ;;  %p1161_p12 = scmp.lt.u32.totalorder %s1157_s24, %s1334_s6 }
 0x40c   :  { %p1163_p13 = pnand %p1161_p12, %p1158_p11 }
 0x40e   :  { %1166 = shalt.err (!%p1163_p13)
}
 0x40f   :  { %610 = dma.vmem_to_hbm [thread:$0]  %s605_s21, 256, %s1334_s6, [#allocation4], %s1182_s22, %s1182_s22, %s1183_s23  }
 0x410   :  { %1175 = dma.done.wait [#allocation4], 256  }
 0x411   :  { %1176 = vsyncadd [#allocation4], 4294967040 }
 0x412   :  { %614 = vsyncpa [#allocation3], 1 }
 0x413   :  { %615 = vsyncpa [#allocation6], 1 }
 0x414   :  { %616 = vsyncpa [#allocation9], 1 }
 0x415   :  { %617 = vsyncpa [#allocation12], 1 }
 0x416   :  { %618 = vsyncpa [#allocation4], 1 }

// kernel: tpu_custom_call.1
= control target key start
LH: loop header
LB: loop body
LE: loop exit
PB: predicated region body
PF: predicated region fallthrough
CT: control target
= control target key end

     0   :  { %11 = vsyncpa [#allocation3], 0  ;;  %s1328_s0 = inlined_call_operand.hbm [shape: f32[16,128], index: 0, kind: input, shape index: {}]   ;;  %s1329_s1 = inlined_call_operand.hbm [shape: f32[128,256], index: 1, kind: input, shape index: {}]   ;;  %s1330_s2 = inlined_call_operand.hbm [shape: f32[128,128], index: 2, kind: input, shape index: {}]   ;;  %s1331_s3 = inlined_call_operand.hbm [shape: f32[128,128], index: 3, kind: input, shape index: {}]   ;;  %s1332_s4 = inlined_call_operand.hbm [shape: f32[128,128], index: 4, kind: input, shape index: {}]   ;;  %s1333_s5 = inlined_call_operand.hbm [shape: f32[128,128], index: 5, kind: input, shape index: {}]   ;;  %s1334_s6 = inlined_call_operand.hbm [shape: f32[16,128], index: 6, kind: output, shape index: {}]  }
   0x1   :  { %12 = vsyncpa [#allocation6], 0 }
   0x2   :  { %13 = vsyncpa [#allocation9], 0 }
   0x3   :  { %14 = vsyncpa [#allocation12], 0 }
   0x4   :  { %15 = vsyncpa [#allocation4], 0  ;;  %s1177_s21 = smov [#allocation5]   ;;  %s1013_s25 = scalar_lea.hbm %s1329_s1, 4096 }
   0x5   :  { %s33_s22 = sshll.u32 %s1177_s21, 4  ;;  %p1014_p0 = scmp.ne.s32.totalorder %s1329_s1, %s1013_s25  ;;  %s34_s22 = int_to_ptr.vmem [resolvable:$true] %s33_s22 }
   0x6   :  { %p1017_p1 = scmp.lt.u32.totalorder %s1013_s25, %s1329_s1 }
   0x8   :  { %p1019_p2 = pnand %p1017_p1, %p1014_p0 }
   0xa   :  { %1022 = shalt.err (!%p1019_p2)
}
   0xb   :  { %s1023_s30 = scalar_lea.vmem %s34_s22, 4096  ;;  %p1028_p4 = scmp.lt.s32.totalorder %s34_s22, %s34_s22 }
   0xc   :  { %p1024_p3 = scmp.ne.s32.totalorder %s34_s22, %s1023_s30  ;;  %p1029_p5 = scmp.lt.s32.totalorder %s1023_s30, %s1023_s30 }
   0xe   :  { %p1030_p6 = por %p1029_p5, %p1028_p4 }
  0x10   :  { %p1031_p7 = pnand %p1030_p6, %p1024_p3 }
  0x12   :  { %1034 = shalt.err (!%p1031_p7)
}
  0x13   :  { %s1178_s7 = smov 256   ;;  %s1179_s8 = smov 16  }
  0x14   :  { %39 = dma.hbm_to_vmem [thread:$0]  %s1329_s1, 4096, %s34_s22, [#allocation6], %s1178_s7, %s1178_s7, %s1179_s8  }
  0x15   :  { %s1180_s11 = smov [#allocation8]   ;;  %s1181_s13 = smov [#allocation2]  }
  0x16   :  { %s57_s12 = sshll.u32 %s1180_s11, 4  ;;  %s21_s14 = sshll.u32 %s1181_s13, 4  ;;  %s58_s12 = int_to_ptr.vmem [resolvable:$true] %s57_s12  ;;  %s22_s14 = int_to_ptr.vmem [resolvable:$true] %s21_s14 }
  0x17   :  { %s1035_s17 = scalar_lea.hbm %s1331_s3, 2048 }
  0x18   :  { %p1036_p8 = scmp.ne.s32.totalorder %s1331_s3, %s1035_s17  ;;  %p1039_p9 = scmp.lt.u32.totalorder %s1035_s17, %s1331_s3 }
  0x1a   :  { %p1041_p10 = pnand %p1039_p9, %p1036_p8 }
  0x1c   :  { %1044 = shalt.err (!%p1041_p10)
}
  0x1d   :  { %s1045_s1 = scalar_lea.vmem %s58_s12, 2048  ;;  %p1050_p12 = scmp.lt.s32.totalorder %s58_s12, %s58_s12 }
  0x1e   :  { %p1046_p11 = scmp.ne.s32.totalorder %s58_s12, %s1045_s1  ;;  %p1051_p13 = scmp.lt.s32.totalorder %s1045_s1, %s1045_s1 }
  0x20   :  { %p1052_p0 = por %p1051_p13, %p1050_p12 }
  0x22   :  { %p1053_p1 = pnand %p1052_p0, %p1046_p11 }
  0x24   :  { %1056 = shalt.err (!%p1053_p1)
}
  0x25   :  { %s1182_s22 = smov 128   ;;  %s1183_s23 = smov 8  }
  0x26   :  { %63 = dma.hbm_to_vmem [thread:$0]  %s1331_s3, 2048, %s58_s12, [#allocation9], %s1182_s22, %s1182_s22, %s1183_s23  }
  0x27   :  { %s1057_s28 = scalar_lea.hbm %s1328_s0, 256 }
  0x28   :  { %p1058_p2 = scmp.ne.s32.totalorder %s1328_s0, %s1057_s28  ;;  %p1061_p3 = scmp.lt.u32.totalorder %s1057_s28, %s1328_s0 }
  0x2a   :  { %p1063_p4 = pnand %p1061_p3, %p1058_p2 }
  0x2c   :  { %1066 = shalt.err (!%p1063_p4)
}
  0x2d   :  { %s1067_s9 = scalar_lea.vmem %s22_s14, 256  ;;  %p1072_p6 = scmp.lt.s32.totalorder %s22_s14, %s22_s14 }
  0x2e   :  { %p1068_p5 = scmp.ne.s32.totalorder %s22_s14, %s1067_s9  ;;  %p1073_p7 = scmp.lt.s32.totalorder %s1067_s9, %s1067_s9 }
  0x30   :  { %p1074_p8 = por %p1073_p7, %p1072_p6 }
  0x32   :  { %p1075_p9 = pnand %p1074_p8, %p1068_p5 }
  0x34   :  { %1078 = shalt.err (!%p1075_p9)
}
  0x35   :  { %27 = dma.hbm_to_vmem [thread:$0]  %s1328_s0, 256, %s22_s14, [#allocation3], %s1182_s22, %s1182_s22, %s1183_s23  }
  0x36   :  { %s1184_s11 = smov [#allocation7]   ;;  %s1185_s13 = smov [#allocation10]  }
  0x37   :  { %s45_s12 = sshll.u32 %s1184_s11, 4  ;;  %s69_s15 = sshll.u32 %s1185_s13, 4  ;;  %s46_s12 = int_to_ptr.vmem [resolvable:$true] %s45_s12  ;;  %s70_s15 = int_to_ptr.vmem [resolvable:$true] %s69_s15 }
  0x38   :  { %s1079_s18 = scalar_lea.hbm %s1330_s2, 2048 }
  0x39   :  { %p1080_p10 = scmp.ne.s32.totalorder %s1330_s2, %s1079_s18  ;;  %p1083_p11 = scmp.lt.u32.totalorder %s1079_s18, %s1330_s2 }
  0x3b   :  { %p1085_p12 = pnand %p1083_p11, %p1080_p10 }
  0x3d   :  { %1088 = shalt.err (!%p1085_p12)
}
  0x3e   :  { %s1089_s0 = scalar_lea.vmem %s46_s12, 2048  ;;  %p1094_p0 = scmp.lt.s32.totalorder %s46_s12, %s46_s12 }
  0x3f   :  { %p1090_p13 = scmp.ne.s32.totalorder %s46_s12, %s1089_s0  ;;  %p1095_p1 = scmp.lt.s32.totalorder %s1089_s0, %s1089_s0 }
  0x41   :  { %p1096_p2 = por %p1095_p1, %p1094_p0 }
  0x43   :  { %p1097_p3 = pnand %p1096_p2, %p1090_p13 }
  0x45   :  { %1100 = shalt.err (!%p1097_p3)
}
  0x46   :  { %51 = dma.hbm_to_vmem [thread:$0]  %s1330_s2, 2048, %s46_s12, [#allocation6], %s1182_s22, %s1182_s22, %s1183_s23  }
  0x47   :  { %s1101_s27 = scalar_lea.hbm %s1332_s4, 2048 }
  0x48   :  { %p1102_p4 = scmp.ne.s32.totalorder %s1332_s4, %s1101_s27  ;;  %p1105_p5 = scmp.lt.u32.totalorder %s1101_s27, %s1332_s4 }
  0x4a   :  { %p1107_p6 = pnand %p1105_p5, %p1102_p4 }
  0x4c   :  { %1110 = shalt.err (!%p1107_p6)
}
  0x4d   :  { %s1111_s8 = scalar_lea.vmem %s70_s15, 2048  ;;  %p1116_p8 = scmp.lt.s32.totalorder %s70_s15, %s70_s15 }
  0x4e   :  { %p1112_p7 = scmp.ne.s32.totalorder %s70_s15, %s1111_s8  ;;  %p1117_p9 = scmp.lt.s32.totalorder %s1111_s8, %s1111_s8 }
  0x50   :  { %p1118_p10 = por %p1117_p9, %p1116_p8 }
  0x52   :  { %p1119_p11 = pnand %p1118_p10, %p1112_p7 }
  0x54   :  { %1122 = shalt.err (!%p1119_p11)
}
  0x55   :  { %75 = dma.hbm_to_vmem [thread:$0]  %s1332_s4, 2048, %s70_s15, [#allocation9], %s1182_s22, %s1182_s22, %s1183_s23  }
  0x56   :  { %s1186_s3 = smov [#allocation11]   ;;  %s1123_s13 = scalar_lea.hbm %s1333_s5, 2048 }
  0x57   :  { %s81_s10 = sshll.u32 %s1186_s3, 4  ;;  %p1124_p12 = scmp.ne.s32.totalorder %s1333_s5, %s1123_s13  ;;  %s82_s10 = int_to_ptr.vmem [resolvable:$true] %s81_s10 }
  0x58   :  { %p1127_p13 = scmp.lt.u32.totalorder %s1123_s13, %s1333_s5 }
  0x5a   :  { %p1129_p0 = pnand %p1127_p13, %p1124_p12 }
  0x5c   :  { %1132 = shalt.err (!%p1129_p0)
}
  0x5d   :  { %s1133_s20 = scalar_lea.vmem %s82_s10, 2048  ;;  %p1138_p2 = scmp.lt.s32.totalorder %s82_s10, %s82_s10 }
  0x5e   :  { %p1134_p1 = scmp.ne.s32.totalorder %s82_s10, %s1133_s20  ;;  %p1139_p3 = scmp.lt.s32.totalorder %s1133_s20, %s1133_s20 }
  0x60   :  { %p1140_p4 = por %p1139_p3, %p1138_p2 }
  0x62   :  { %p1141_p5 = pnand %p1140_p4, %p1134_p1 }
  0x64   :  { %1144 = shalt.err (!%p1141_p5)
}
  0x65   :  { %87 = dma.hbm_to_vmem [thread:$0]  %s1333_s5, 2048, %s82_s10, [#allocation12], %s1182_s22, %s1182_s22, %s1183_s23  }
  0x66   :  { %1167 = dma.done.wait [#allocation3], 256  }
  0x67   :  { %1168 = vsyncadd [#allocation3], 4294967040 }
  0x68   :  { %1169 = dma.done.wait [#allocation6], 6144  }
  0x69   :  { %1170 = vsyncadd [#allocation6], 4294961152 }
  0x6a   :  { %1171 = dma.done.wait [#allocation9], 4096  }
  0x6b   :  { %1172 = vsyncadd [#allocation9], 4294963200 }
  0x6c   :  { %1173 = dma.done.wait [#allocation12], 2048  }
  0x6d   :  { %1174 = vsyncadd [#allocation12], 4294965248  ;;  %v1187_v0 = vmov 0.0   ;;  %v109_v1 = vld [vmem:[#allocation5 + $0x8] sm:$0xff]  ;;  %v111_v2 = vld [vmem:[#allocation5 + $0x18] sm:$0xff]  ;;  %s1188_s5 = smov [#allocation13]  }
  0x6e   :  { %204 = vmatprep.mubr.f32.mxu0 %v1187_v0  ;;  %v108_v3 = vld [vmem:[#allocation5] sm:$0xff]  ;;  %v833_v4 = vpack.c.bf16 %v111_v2, %v109_v1  ;;  %v110_v5 = vld [vmem:[#allocation5 + $0x10] sm:$0xff]  ;;  %v113_v6 = vld [vmem:[#allocation5 + $0x28] sm:$0xff]  ;;  %s604_s21 = sshll.u32 %s1188_s5, 4  ;;  %s605_s21 = int_to_ptr.vmem [resolvable:$true] %s604_s21 }
  0x6f   :  { %v115_v7 = vld [vmem:[#allocation5 + $0x38] sm:$0xff]  ;;  %v835_v8 = vpack.c.bf16 %v110_v5, %v108_v3  ;;  %v112_v10 = vld [vmem:[#allocation5 + $0x20] sm:$0xff]  ;;  %v114_v11 = vld [vmem:[#allocation5 + $0x30] sm:$0xff]  ;;  %s1145_s1 = scalar_lea.vmem %s605_s21, 256  ;;  %p1150_p7 = scmp.lt.s32.totalorder %s605_s21, %s605_s21 }
  0x70   :  { %v837_v9 = vpack.c.bf16 %v115_v7, %v113_v6  ;;  %v117_v12 = vld [vmem:[#allocation5 + $0x48] sm:$0xff]  ;;  %834 = vmatprep.subr.bf16.mxu0 %v833_v4  ;;  %v119_v13 = vld [vmem:[#allocation5 + $0x58] sm:$0xff]  ;;  %v839_v14 = vpack.c.bf16 %v114_v11, %v112_v10  ;;  %v116_v16 = vld [vmem:[#allocation5 + $0x40] sm:$0xff]  ;;  %p1146_p6 = scmp.ne.s32.totalorder %s605_s21, %s1145_s1  ;;  %p1151_p8 = scmp.lt.s32.totalorder %s1145_s1, %s1145_s1 }
  0x71   :  { %836 = vmatpush1.bf16.msra.mxu0 %v835_v8  ;;  %v841_v15 = vpack.c.bf16 %v119_v13, %v117_v12  ;;  %v118_v17 = vld [vmem:[#allocation5 + $0x50] sm:$0xff]  ;;  %v121_v18 = vld [vmem:[#allocation5 + $0x68] sm:$0xff]  ;;  %v123_v19 = vld [vmem:[#allocation5 + $0x78] sm:$0xff] }
  0x72   :  { %838 = vmatprep.subr.bf16.mxu0 %v837_v9  ;;  %v843_v20 = vpack.c.bf16 %v118_v17, %v116_v16  ;;  %v845_v21 = vpack.c.bf16 %v123_v19, %v121_v18  ;;  %v120_v22 = vld [vmem:[#allocation5 + $0x60] sm:$0xff]  ;;  %v122_v23 = vld [vmem:[#allocation5 + $0x70] sm:$0xff]  ;;  %v125_v24 = vld [vmem:[#allocation5 + $0x88] sm:$0xff]  ;;  %p1152_p9 = por %p1151_p8, %p1150_p7 }
  0x73   :  { %v127_v25 = vld [vmem:[#allocation5 + $0x98] sm:$0xff]  ;;  %v217_v26 = vld [vmem:[#allocation7] sm:$0xff]  ;;  %v218_v27 = vld [vmem:[#allocation7 + $0x8] sm:$0xff]  ;;  %v847_v28 = vpack.c.bf16 %v122_v23, %v120_v22 }
  0x74   :  { %v124_v29 = vld [vmem:[#allocation5 + $0x80] sm:$0xff]  ;;  %v865_v30 = vpack.c.bf16 %v218_v27, %v217_v26  ;;  %v219_v31 = vld [vmem:[#allocation7 + $0x10] sm:$0xff]  ;;  %v849_v32 = vpack.c.bf16 %v127_v25, %v125_v24  ;;  %v129_v34 = vld [vmem:[#allocation5 + $0xa8] sm:$0xff]  ;;  %p1153_p10 = pnand %p1152_p9, %p1146_p6 }
  0x75   :  { %840 = vmatpush1.bf16.msra.mxu0 %v839_v14  ;;  %v126_v33 = vld [vmem:[#allocation5 + $0x90] sm:$0xff]  ;;  %v220_v35 = vld [vmem:[#allocation7 + $0x18] sm:$0xff]  ;;  %v221_v38 = vld [vmem:[#allocation7 + $0x20] sm:$0xff] }
  0x76   :  { %842 = vmatprep.subr.bf16.mxu0 %v841_v15  ;;  %v131_v36 = vld [vmem:[#allocation5 + $0xb8] sm:$0xff]  ;;  %866 = vmatprep.subr.bf16.mxu1 %v865_v30  ;;  %v869_v37 = vpack.c.bf16 %v220_v35, %v219_v31  ;;  %v222_v39 = vld [vmem:[#allocation7 + $0x28] sm:$0xff]  ;;  %v851_v40 = vpack.c.bf16 %v126_v33, %v124_v29  ;;  %v128_v41 = vld [vmem:[#allocation5 + $0xa0] sm:$0xff] }
  0x77   :  { %868 = vmatpush3.bf16.msra.mxu1 %v865_v30  ;;  %v873_v42 = vpack.c.bf16 %v222_v39, %v221_v38  ;;  %v853_v43 = vpack.c.bf16 %v131_v36, %v129_v34  ;;  %v130_v44 = vld [vmem:[#allocation5 + $0xb0] sm:$0xff]  ;;  %v224_v46 = vld [vmem:[#allocation7 + $0x38] sm:$0xff]  ;;  %v133_v47 = vld [vmem:[#allocation5 + $0xc8] sm:$0xff] }
  0x78   :  { %870 = vmatprep.subr.bf16.mxu1 %v869_v37  ;;  %v223_v45 = vld [vmem:[#allocation7 + $0x30] sm:$0xff]  ;;  %v135_v48 = vld [vmem:[#allocation5 + $0xd8] sm:$0xff]  ;;  %v855_v49 = vpack.c.bf16 %v130_v44, %v128_v41  ;;  %v132_v50 = vld [vmem:[#allocation5 + $0xc0] sm:$0xff] }
  0x79   :  { %844 = vmatpush1.bf16.msra.mxu0 %v843_v20  ;;  %v877_v51 = vpack.c.bf16 %v224_v46, %v223_v45  ;;  %v857_v52 = vpack.c.bf16 %v135_v48, %v133_v47  ;;  %v134_v53 = vld [vmem:[#allocation5 + $0xd0] sm:$0xff]  ;;  %v225_v54 = vld [vmem:[#allocation7 + $0x40] sm:$0xff]  ;;  %v226_v55 = vld [vmem:[#allocation7 + $0x48] sm:$0xff] }
  0x7a   :  { %846 = vmatprep.subr.bf16.mxu0 %v845_v21  ;;  %v137_v56 = vld [vmem:[#allocation5 + $0xe8] sm:$0xff]  ;;  %v139_v57 = vld [vmem:[#allocation5 + $0xf8] sm:$0xff]  ;;  %v859_v58 = vpack.c.bf16 %v134_v53, %v132_v50  ;;  %v136_v59 = vld [vmem:[#allocation5 + $0xe0] sm:$0xff]  ;;  %v881_v60 = vpack.c.bf16 %v226_v55, %v225_v54 }
  0x7b   :  { %872 = vmatpush3.bf16.msra.mxu1 %v869_v37  ;;  %v861_v61 = vpack.c.bf16 %v139_v57, %v137_v56  ;;  %v138_v62 = vld [vmem:[#allocation5 + $0xf0] sm:$0xff]  ;;  %v228_v1 = vld [vmem:[#allocation7 + $0x58] sm:$0xff]  ;;  %v308_v2 = vld [vmem:[#allocation8] sm:$0xff] }
  0x7c   :  { %874 = vmatprep.subr.bf16.mxu1 %v873_v42  ;;  %v227_v63 = vld [vmem:[#allocation7 + $0x50] sm:$0xff]  ;;  %v309_v3 = vld [vmem:[#allocation8 + $0x8] sm:$0xff]  ;;  %v863_v4 = vpack.c.bf16 %v138_v62, %v136_v59  ;;  %v311_v8 = vld [vmem:[#allocation8 + $0x18] sm:$0xff] }
  0x7d   :  { %848 = vmatpush1.bf16.msra.mxu0 %v847_v28  ;;  %v885_v5 = vpack.c.bf16 %v228_v1, %v227_v63  ;;  %v897_v6 = vpack.c.bf16 %v309_v3, %v308_v2  ;;  %v310_v7 = vld [vmem:[#allocation8 + $0x10] sm:$0xff]  ;;  %v229_v9 = vld [vmem:[#allocation7 + $0x60] sm:$0xff]  ;;  %v230_v10 = vld [vmem:[#allocation7 + $0x68] sm:$0xff] }
  0x7e   :  { %850 = vmatprep.subr.bf16.mxu0 %v849_v32  ;;  %v106_v11 = vld [vmem:[#allocation2] sm:$0xff]  ;;  %v901_v12 = vpack.c.bf16 %v311_v8, %v310_v7  ;;  %v889_v13 = vpack.c.bf16 %v230_v10, %v229_v9  ;;  %v312_v14 = vld [vmem:[#allocation8 + $0x20] sm:$0xff]  ;;  %v313_v15 = vld [vmem:[#allocation8 + $0x28] sm:$0xff] }
  0x7f   :  { %876 = vmatpush3.bf16.msra.mxu1 %v873_v42  ;;  %v107_v16 = vld [vmem:[#allocation2 + $0x8] sm:$0xff]  ;;  %v905_v17 = vpack.c.bf16 %v313_v15, %v312_v14  ;;  %v314_v18 = vld [vmem:[#allocation8 + $0x30] sm:$0xff]  ;;  %v316_v21 = vld [vmem:[#allocation8 + $0x40] sm:$0xff] }
  0x80   :  { %878 = vmatprep.subr.bf16.mxu1 %v877_v51  ;;  %v315_v19 = vld [vmem:[#allocation8 + $0x38] sm:$0xff]  ;;  %v317_v22 = vld [vmem:[#allocation8 + $0x48] sm:$0xff]  ;;  %v318_v24 = vld [vmem:[#allocation8 + $0x50] sm:$0xff] }
  0x81   :  { %852 = vmatpush1.bf16.msra.mxu0 %v851_v40  ;;  %v909_v20 = vpack.c.bf16 %v315_v19, %v314_v18  ;;  %v913_v23 = vpack.c.bf16 %v317_v22, %v316_v21  ;;  %v319_v25 = vld [vmem:[#allocation8 + $0x58] sm:$0xff]  ;;  %v320_v26 = vld [vmem:[#allocation8 + $0x60] sm:$0xff]  ;;  %v321_v27 = vld [vmem:[#allocation8 + $0x68] sm:$0xff] }
  0x82   :  { %854 = vmatprep.subr.bf16.mxu0 %v853_v43  ;;  %v921_v28 = vpack.c.bf16 %v321_v27, %v320_v26  ;;  %v231_v29 = vld [vmem:[#allocation7 + $0x70] sm:$0xff]  ;;  %v232_v30 = vld [vmem:[#allocation7 + $0x78] sm:$0xff]  ;;  %v415_v39 = vld [vmem:[#allocation10] sm:$0xff] }
  0x83   :  { %880 = vmatpush3.bf16.msra.mxu1 %v877_v51  ;;  %v893_v31 = vpack.c.bf16 %v232_v30, %v231_v29  ;;  %v322_v32 = vld [vmem:[#allocation8 + $0x70] sm:$0xff]  ;;  %v323_v33 = vld [vmem:[#allocation8 + $0x78] sm:$0xff]  ;;  %v416_v40 = vld [vmem:[#allocation10 + $0x8] sm:$0xff] }
  0x84   :  { %882 = vmatprep.subr.bf16.mxu1 %v881_v60  ;;  %v925_v34 = vpack.c.bf16 %v323_v33, %v322_v32  ;;  %v929_v41 = vpack.c.bf16 %v416_v40, %v415_v39  ;;  %v417_v42 = vld [vmem:[#allocation10 + $0x10] sm:$0xff]  ;;  %v418_v43 = vld [vmem:[#allocation10 + $0x18] sm:$0xff]  ;;  %v419_v45 = vld [vmem:[#allocation10 + $0x20] sm:$0xff] }
  0x85   :  { %856 = vmatpush1.bf16.msra.mxu0 %v855_v49  ;;  %v933_v44 = vpack.c.bf16 %v418_v43, %v417_v42  ;;  %v420_v46 = vld [vmem:[#allocation10 + $0x28] sm:$0xff]  ;;  %v421_v48 = vld [vmem:[#allocation10 + $0x30] sm:$0xff]  ;;  %v422_v49 = vld [vmem:[#allocation10 + $0x38] sm:$0xff] }
  0x86   :  { %858 = vmatprep.subr.bf16.mxu0 %v857_v52  ;;  %v937_v47 = vpack.c.bf16 %v420_v46, %v419_v45  ;;  %v941_v50 = vpack.c.bf16 %v422_v49, %v421_v48  ;;  %v423_v51 = vld [vmem:[#allocation10 + $0x40] sm:$0xff]  ;;  %v424_v52 = vld [vmem:[#allocation10 + $0x48] sm:$0xff]  ;;  %v425_v54 = vld [vmem:[#allocation10 + $0x50] sm:$0xff] }
  0x87   :  { %884 = vmatpush3.bf16.msra.mxu1 %v881_v60  ;;  %v945_v53 = vpack.c.bf16 %v424_v52, %v423_v51  ;;  %v426_v55 = vld [vmem:[#allocation10 + $0x58] sm:$0xff]  ;;  %v427_v57 = vld [vmem:[#allocation10 + $0x60] sm:$0xff]  ;;  %v429_v60 = vld [vmem:[#allocation10 + $0x70] sm:$0xff] }
  0x88   :  { %886 = vmatprep.subr.bf16.mxu1 %v885_v5  ;;  %v949_v56 = vpack.c.bf16 %v426_v55, %v425_v54  ;;  %v506_v63 = vld [vmem:[#allocation11] sm:$0xff]  ;;  %v507_v1 = vld [vmem:[#allocation11 + $0x8] sm:$0xff]  ;;  %v508_v2 = vld [vmem:[#allocation11 + $0x10] sm:$0xff] }
  0x89   :  { %860 = vmatpush1.bf16.msra.mxu0 %v859_v58  ;;  %v428_v58 = vld [vmem:[#allocation10 + $0x68] sm:$0xff]  ;;  %v961_v3 = vpack.c.bf16 %v507_v1, %v506_v63  ;;  %v512_v9 = vld [vmem:[#allocation11 + $0x30] sm:$0xff]  ;;  %v513_v10 = vld [vmem:[#allocation11 + $0x38] sm:$0xff] }
  0x8a   :  { %862 = vmatprep.subr.bf16.mxu0 %v861_v61  ;;  %v953_v59 = vpack.c.bf16 %v428_v58, %v427_v57  ;;  %v430_v61 = vld [vmem:[#allocation10 + $0x78] sm:$0xff]  ;;  %v511_v7 = vld [vmem:[#allocation11 + $0x28] sm:$0xff]  ;;  %v516_v15 = vld [vmem:[#allocation11 + $0x50] sm:$0xff] }
  0x8b   :  { %888 = vmatpush3.bf16.msra.mxu1 %v885_v5  ;;  %v957_v62 = vpack.c.bf16 %v430_v61, %v429_v60  ;;  %v518_v18 = vld [vmem:[#allocation11 + $0x60] sm:$0xff]  ;;  %v519_v19 = vld [vmem:[#allocation11 + $0x68] sm:$0xff]  ;;  %v520_v21 = vld [vmem:[#allocation11 + $0x70] sm:$0xff] }
  0x8c   :  { %890 = vmatprep.subr.bf16.mxu1 %v889_v13  ;;  %v521_v22 = vld [vmem:[#allocation11 + $0x78] sm:$0xff] }
  0x8d   :  { %864 = vmatpush1.bf16.msra.mxu0 %v863_v4  ;;  %v509_v4 = vld [vmem:[#allocation11 + $0x18] sm:$0xff] }
  0x8e   :  { %898 = vmatprep.subr.bf16.mxu0 %v897_v6  ;;  %v965_v5 = vpack.c.bf16 %v509_v4, %v508_v2 }
  0x8f   :  { %892 = vmatpush3.bf16.msra.mxu1 %v889_v13  ;;  %v515_v13 = vld [vmem:[#allocation11 + $0x48] sm:$0xff] }
  0x90   :  { %205 = vmatmul.mubr.f32.vlgmr.msra.gmra.mrb[0].mxu0 %v106_v11  ;;  %894 = vmatprep.subr.bf16.mxu1 %v893_v31  ;;  %v973_v11 = vpack.c.bf16 %v513_v10, %v512_v9 }
  0x91   :  { %210 = vmatprep.mubr.f32.mxu0 %v1187_v0  ;;  %900 = vmatpush3.bf16.msra.mxu0 %v897_v6  ;;  %v917_v0 = vpack.c.bf16 %v319_v25, %v318_v24  ;;  %v510_v6 = vld [vmem:[#allocation11 + $0x20] sm:$0xff] }
  0x92   :  { %902 = vmatprep.subr.bf16.mxu0 %v901_v12  ;;  %v969_v8 = vpack.c.bf16 %v511_v7, %v510_v6 }
  0x93   :  { %896 = vmatpush3.bf16.msra.mxu1 %v893_v31 }
  0x94   :  { %211 = vmatmul.mubr.f32.gmra.mrb[2].mxu0 %v107_v16  ;;  %930 = vmatprep.subr.bf16.mxu1 %v929_v41  ;;  %v517_v16 = vld [vmem:[#allocation11 + $0x58] sm:$0xff] }
  0x95   :  { %904 = vmatpush3.bf16.msra.mxu0 %v901_v12  ;;  %v514_v12 = vld [vmem:[#allocation11 + $0x40] sm:$0xff] }
  0x96   :  { %906 = vmatprep.subr.bf16.mxu0 %v905_v17  ;;  %v977_v14 = vpack.c.bf16 %v515_v13, %v514_v12 }
  0x99   :  { %908 = vmatpush3.bf16.msra.mxu0 %v905_v17  ;;  %v981_v17 = vpack.c.bf16 %v517_v16, %v516_v15 }
  0x9a   :  { %910 = vmatprep.subr.bf16.mxu0 %v909_v20 }
  0x9d   :  { %912 = vmatpush3.bf16.msra.mxu0 %v909_v20  ;;  %v985_v20 = vpack.c.bf16 %v519_v19, %v518_v18 }
  0x9e   :  { %914 = vmatprep.subr.bf16.mxu0 %v913_v23 }
  0xa1   :  { %916 = vmatpush3.bf16.msra.mxu0 %v913_v23  ;;  %v989_v23 = vpack.c.bf16 %v521_v22, %v520_v21 }
  0xa2   :  { %918 = vmatprep.subr.bf16.mxu0 %v917_v0 }
  0xa5   :  { %920 = vmatpush3.bf16.msra.mxu0 %v917_v0 }
  0xa6   :  { %922 = vmatprep.subr.bf16.mxu0 %v921_v28 }
  0xa9   :  { %924 = vmatpush3.bf16.msra.mxu0 %v921_v28 }
  0xaa   :  { %926 = vmatprep.subr.bf16.mxu0 %v925_v34 }
  0xad   :  { %928 = vmatpush3.bf16.msra.mxu0 %v925_v34 }
  0xae   :  { %962 = vmatprep.subr.bf16.mxu0 %v961_v3 }
 0x163   :  { %v206_v35 = vpop.f32.mrb[0].mxu0 }
 0x164   :  { %v208_v36 = vpop.f32.mrb[1].mxu0  ;;  %725 = vmatprep.mubr.f32.mxu1 %v206_v35 }
 0x165   :  { %760 = vmatprep.mubr.f32.mxu0 %v208_v36 }
 0x167   :  { %v212_v37 = vpop.f32.mrb[2].mxu0 }
 0x168   :  { %v214_v38 = vpop.f32.mrb[3].mxu0  ;;  %726 = vmatmul.mubr.f32.vlgmr.msra.gmra.mrb[0].mxu1 %v212_v37 }
 0x169   :  { %761 = vmatmul.mubr.f32.vlgmr.msra.gmra.mrb[4].mxu0 %v214_v38  ;;  %932 = vmatpush3.bf16.msra.mxu1 %v929_v41 }
 0x16a   :  { %934 = vmatprep.subr.bf16.mxu1 %v933_v44  ;;  %964 = vmatpush3.bf16.msra.mxu0 %v961_v3 }
 0x16b   :  { %966 = vmatprep.subr.bf16.mxu0 %v965_v5 }
 0x16d   :  { %936 = vmatpush3.bf16.msra.mxu1 %v933_v44 }
 0x16e   :  { %938 = vmatprep.subr.bf16.mxu1 %v937_v47  ;;  %968 = vmatpush3.bf16.msra.mxu0 %v965_v5 }
 0x16f   :  { %970 = vmatprep.subr.bf16.mxu0 %v969_v8 }
 0x171   :  { %940 = vmatpush3.bf16.msra.mxu1 %v937_v47 }
 0x172   :  { %942 = vmatprep.subr.bf16.mxu1 %v941_v50  ;;  %972 = vmatpush3.bf16.msra.mxu0 %v969_v8 }
 0x173   :  { %974 = vmatprep.subr.bf16.mxu0 %v973_v11 }
 0x175   :  { %944 = vmatpush3.bf16.msra.mxu1 %v941_v50 }
 0x176   :  { %946 = vmatprep.subr.bf16.mxu1 %v945_v53  ;;  %976 = vmatpush3.bf16.msra.mxu0 %v973_v11 }
 0x177   :  { %978 = vmatprep.subr.bf16.mxu0 %v977_v14 }
 0x179   :  { %948 = vmatpush3.bf16.msra.mxu1 %v945_v53 }
 0x17a   :  { %950 = vmatprep.subr.bf16.mxu1 %v949_v56  ;;  %980 = vmatpush3.bf16.msra.mxu0 %v977_v14 }
 0x17b   :  { %982 = vmatprep.subr.bf16.mxu0 %v981_v17 }
 0x17d   :  { %952 = vmatpush3.bf16.msra.mxu1 %v949_v56 }
 0x17e   :  { %954 = vmatprep.subr.bf16.mxu1 %v953_v59  ;;  %984 = vmatpush3.bf16.msra.mxu0 %v981_v17 }
 0x17f   :  { %986 = vmatprep.subr.bf16.mxu0 %v985_v20 }
 0x181   :  { %956 = vmatpush3.bf16.msra.mxu1 %v953_v59 }
 0x182   :  { %958 = vmatprep.subr.bf16.mxu1 %v957_v62  ;;  %988 = vmatpush3.bf16.msra.mxu0 %v985_v20 }
 0x183   :  { %990 = vmatprep.subr.bf16.mxu0 %v989_v23 }
 0x185   :  { %960 = vmatpush3.bf16.msra.mxu1 %v957_v62 }
 0x186   :  { %992 = vmatpush3.bf16.msra.mxu0 %v989_v23 }
 0x23b   :  { %v727_v24 = vpop.f32.mrb[0].mxu1 }
 0x23c   :  { %v620_v25 = vmul.f32 -1.442695, %v727_v24  ;;  %v299_v0 = vpop.f32.mrb[1].mxu1  ;;  %v762_v26 = vpop.f32.mrb[4].mxu0 }
 0x23d   :  { %v619_v27 = vmul.f32 -1.442695, %v299_v0  ;;  %v390_v28 = vpop.f32.mrb[5].mxu0 }
 0x23e   :  { %1005 = vpow2.f32 %v620_v25 }
 0x23f   :  { %1007 = vpow2.f32 %v619_v27 }
 0x248   :  { %v1006_v29 = vpop.eup %1005 }
 0x249   :  { %v1008_v30 = vpop.eup %1007  ;;  %v406_v31 = vadd.f32 1.0, %v1006_v29 }
 0x24a   :  { %v405_v32 = vadd.f32 1.0, %v1008_v30 }
 0x24b   :  { %1009 = vrcp.f32 %v406_v31 }
 0x24c   :  { %1011 = vrcp.f32 %v405_v32 }
 0x255   :  { %v1010_v33 = vpop.eup %1009 }
 0x256   :  { %v1012_v34 = vpop.eup %1011  ;;  %v412_v35 = vmul.f32 %v1010_v33, %v727_v24 }
 0x257   :  { %v411_v36 = vmul.f32 %v1012_v34, %v299_v0 }
 0x258   :  { %v414_v37 = vmul.f32 %v762_v26, %v412_v35 }
 0x259   :  { %v413_v38 = vmul.f32 %v411_v36, %v390_v28 }
 0x25b   :  { %795 = vmatprep.mubr.f32.mxu1 %v413_v38 }
 0x25c   :  { %796 = vmatmul.mubr.f32.vlgmr.msra.gmra.mrb[2].mxu1 %v414_v37 }
 0x32f   :  { %v797_v39 = vpop.f32.mrb[2].mxu1 }
 0x330   :  { %v497_v40 = vpop.f32.mrb[3].mxu1 }
 0x331   :  { %830 = vmatprep.mubr.f32.mxu0 %v497_v40 }
 0x332   :  { %831 = vmatmul.mubr.f32.vlgmr.msra.gmra.mrb[6].mxu0 %v797_v39 }
 0x405   :  { %v832_v41 = vpop.f32.mrb[6].mxu0 }
 0x406   :  { %598 = vst [vmem:[#allocation13 + $0x8] sm:$0xff] %v832_v41  ;;  %v588_v42 = vpop.f32.mrb[7].mxu0 }
 0x407   :  { %597 = vst [vmem:[#allocation13] sm:$0xff] %v588_v42 }
 0x408   :  { %1156 = shalt.err (!%p1153_p10)
}
 0x409   :  { %s1157_s24 = scalar_lea.hbm %s1334_s6, 256 }
 0x40a   :  { %p1158_p11 = scmp.ne.s32.totalorder %s1334_s6, %s1157_s24  ;;  %p1161_p12 = scmp.lt.u32.totalorder %s1157_s24, %s1334_s6 }
 0x40c   :  { %p1163_p13 = pnand %p1161_p12, %p1158_p11 }
 0x40e   :  { %1166 = shalt.err (!%p1163_p13)
}
 0x40f   :  { %610 = dma.vmem_to_hbm [thread:$0]  %s605_s21, 256, %s1334_s6, [#allocation4], %s1182_s22, %s1182_s22, %s1183_s23  }
 0x410   :  { %1175 = dma.done.wait [#allocation4], 256  }
 0x411   :  { %1176 = vsyncadd [#allocation4], 4294967040 }
 0x412   :  { %614 = vsyncpa [#allocation3], 1 }
 0x413   :  { %615 = vsyncpa [#allocation6], 1 }
 0x414   :  { %616 = vsyncpa [#allocation9], 1 }
 0x415   :  { %617 = vsyncpa [#allocation12], 1 }
 0x416   :  { %618 = vsyncpa [#allocation4], 1 }

</bundles_post_ra>
